<compile_context>
chip_gen: v7x
topology: tpu7x:2x2x1
jax: 0.10.0
libtpu: 0.0.40
codegen_flags: <defaults>
</compile_context>

<pallas_src>
import jax
import jax.numpy as jnp
import numpy as np
from jax.experimental import pallas as pl
from jax.experimental.pallas import tpu as pltpu

LANE = 128


def _round_up(x, m):
    return ((x + m - 1) // m) * m


# ----------------------------- Pallas kernel -------------------------------


def down_fused_kernel(x_ref, w1_ref, b1_ref, w2_ref, b2_ref, out_ref):
    """AvgPool2d(2) -> [conv3x3 -> foldedBN -> ReLU] x 2, fused in VMEM.

    x_ref   : (1, H2, 2*W*Cin)   row-pair packed, lane-dense input block
    w1_ref  : (9, Cin, MidP)     tap-major folded weights (BN1 + 0.25 pool scale)
    b1_ref  : (1, MidP)
    w2_ref  : (9, MidP, CoutP)   tap-major folded weights (BN2)
    b2_ref  : (1, CoutP)
    out_ref : (1, H2*W2, CoutP)  lane-dense output block
    """
    _, h2, wc2 = x_ref.shape
    cin = w1_ref.shape[1]
    midp = w1_ref.shape[2]
    coutp = out_ref.shape[-1]
    w2s = wc2 // (4 * cin)                     # pooled width

    # ---- 2x2 average pool (the 0.25 scale is folded into w1) ---------------
    x = x_ref[0].astype(jnp.float32)           # (H2, 2*W*Cin) = [row 2i | row 2i+1]
    half = wc2 // 2
    s = x[:, :half] + x[:, half:]              # vertical pair sum, (H2, W*Cin)
    s = s.reshape(h2, w2s, 2 * cin)
    pooled = s[:, :, :cin] + s[:, :, cin:]     # horizontal pair sum, (H2, W2, Cin)

    # ---- 3x3 conv (+ folded BN bias) + ReLU: 9 accumulating MXU dots -------
    def conv3x3_bias_relu(xin, w_ref, b_ref):
        h, w, c = xin.shape
        co = w_ref.shape[-1]
        zrow = jnp.zeros((1, w, c), jnp.float32)
        zcol = jnp.zeros((h + 2, 1, c), jnp.float32)
        xp = jnp.concatenate([zrow, xin, zrow], axis=0)          # H halo, (h+2, w, c)
        # dx-shifted variants with zero fill at the W border; the dy taps are
        # then free outer-dim slices so each (h*w, c) reshape needs no relayout.
        shifted = (
            jnp.concatenate([zcol, xp[:, :w - 1, :]], axis=1),   # x[:, j-1, :]
            xp,                                                  # x[:, j  , :]
            jnp.concatenate([xp[:, 1:, :], zcol], axis=1),       # x[:, j+1, :]
        )
        acc = jnp.zeros((h * w, co), jnp.float32)
        for dy in range(3):
            for dx in range(3):
                lhs = shifted[dx][dy:dy + h].reshape(h * w, c)
                acc = acc + jnp.dot(lhs, w_ref[dy * 3 + dx],
                                    preferred_element_type=jnp.float32)
        return jnp.maximum(acc + b_ref[...], 0.0)                # (h*w, co)

    y1 = conv3x3_bias_relu(pooled, w1_ref, b1_ref)               # (H2*W2, MidP)
    y2 = conv3x3_bias_relu(y1.reshape(h2, w2s, midp), w2_ref, b2_ref)
    out_ref[...] = y2.reshape(1, h2 * w2s, coutp).astype(out_ref.dtype)


# ------------------------------- wrappers ----------------------------------


def down_fused(x_nhwc, w1, b1, w2, b2):
    """x_nhwc: (N, H, W, Cin) -> (N, H/2, W/2, CoutP); all stages in one kernel."""
    n, h, w, cin = x_nhwc.shape
    h2, w2s = h // 2, w // 2
    mid_p = w1.shape[-1]
    cout_p = w2.shape[-1]

    # Pack the two rows of each 2x2 pool window into one lane-dense row
    # (free, contiguous reshape in HBM): last dim = 2*W*Cin (= 128 here).
    x3 = x_nhwc.reshape(n, h2, 2 * w * cin)

    out = pl.pallas_call(
        down_fused_kernel,
        out_shape=jax.ShapeDtypeStruct((n, h2 * w2s, cout_p), x_nhwc.dtype),
        grid=(n,),
        in_specs=[
            pl.BlockSpec((1, h2, 2 * w * cin), lambda i: (i, 0, 0)),
            pl.BlockSpec((9, cin, mid_p), lambda i: (0, 0, 0)),     # resident weights
            pl.BlockSpec((1, mid_p), lambda i: (0, 0)),
            pl.BlockSpec((9, mid_p, cout_p), lambda i: (0, 0, 0)),
            pl.BlockSpec((1, cout_p), lambda i: (0, 0)),
        ],
        out_specs=pl.BlockSpec((1, h2 * w2s, cout_p), lambda i: (i, 0, 0)),
        compiler_params=pltpu.CompilerParams(
            dimension_semantics=("parallel",)),
    )(x3, w1, b1, w2, b2)
    return out.reshape(n, h2, w2s, cout_p)


def fold_conv_bn(w_oihw, conv_b, gamma, beta, mean, var, *, eps=1e-5,
                 input_scale=1.0, cin_pad=None, cout_pad=None):
    """Fold eval-mode BatchNorm (and an optional linear input scale, e.g. the
    0.25 avgpool factor) into the conv weight/bias.

    Returns weight (9, CinPad, CoutPad) tap-major (dy*3+dx) and bias (1, CoutPad),
    zero-padded on the channel axes so padded lanes contribute/produce zeros.
    """
    cout, cin = w_oihw.shape[0], w_oihw.shape[1]
    scale = gamma / jnp.sqrt(var + eps)                           # (Cout,)
    w = jnp.transpose(w_oihw, (2, 3, 1, 0)).reshape(9, cin, cout) # (tap, I, O)
    w = w * (input_scale * scale)[None, None, :]
    b = (conv_b - mean) * scale + beta
    cin_pad = cin_pad or cin
    cout_pad = cout_pad or cout
    w = jnp.pad(w, ((0, 0), (0, cin_pad - cin), (0, cout_pad - cout)))
    b = jnp.pad(b, ((0, cout_pad - cout),))
    return w, b[None, :]


@jax.jit
def down_forward(x_nchw, params):
    mid = params["conv1_w"].shape[0]
    cout = params["conv2_w"].shape[0]
    mid_p = _round_up(mid, LANE)
    cout_p = _round_up(cout, LANE)
    w1, b1 = fold_conv_bn(params["conv1_w"], params["conv1_b"], *params["bn1"],
                          input_scale=0.25, cout_pad=mid_p)
    w2, b2 = fold_conv_bn(params["conv2_w"], params["conv2_b"], *params["bn2"],
                          cin_pad=mid_p, cout_pad=cout_p)
    x = jnp.transpose(x_nchw, (0, 2, 3, 1))            # NCHW -> NHWC
    y = down_fused(x, w1, b1, w2, b2)                  # (N, H2, W2, CoutP)
    y = y[..., :cout]                                  # trim lane padding
    return jnp.transpose(y, (0, 3, 1, 2))              # NHWC -> NCHW


# --------------------------- parameter creation -----------------------------


def init_down_params(key, in_channels, out_channels):
    mid = out_channels
    ks = jax.random.split(key, 6)

    def conv_w(k, cout, cin):
        # PyTorch Conv2d weight layout: OIHW.
        return 0.1 * jax.random.normal(k, (cout, cin, 3, 3), jnp.float32)

    def bn(k, c):
        k1, k2, k3, k4 = jax.random.split(k, 4)
        gamma = 1.0 + 0.1 * jax.random.normal(k1, (c,), jnp.float32)
        beta = 0.1 * jax.random.normal(k2, (c,), jnp.float32)
        mean = 0.1 * jax.random.normal(k3, (c,), jnp.float32)
        var = jax.random.uniform(k4, (c,), jnp.float32, minval=0.5, maxval=1.5)
        return (gamma, beta, mean, var)

    return dict(
        conv1_w=conv_w(ks[0], mid, in_channels),
        conv1_b=0.1 * jax.random.normal(ks[1], (mid,), jnp.float32),
        bn1=bn(ks[2], mid),
        conv2_w=conv_w(ks[3], out_channels, mid),
        conv2_b=0.1 * jax.random.normal(ks[4], (out_channels,), jnp.float32),
        bn2=bn(ks[5], out_channels),
    )


# ------------------------------ JAX reference -------------------------------


def ref_forward(x_nchw, params):
    x = jnp.transpose(x_nchw, (0, 2, 3, 1))
    n, h, w, c = x.shape
    p = x.reshape(n, h // 2, 2, w // 2, 2, c).mean(axis=(2, 4))

    def block(xin, w_oihw, cb, bn, eps=1e-5):
        gamma, beta, mean, var = bn
        wk = jnp.transpose(w_oihw, (2, 3, 1, 0))       # OIHW -> HWIO
        y = jax.lax.conv_general_dilated(
            xin, wk, window_strides=(1, 1), padding=((1, 1), (1, 1)),
            dimension_numbers=("NHWC", "HWIO", "NHWC")) + cb
        y = (y - mean) * (gamma / jnp.sqrt(var + eps)) + beta
        return jnp.maximum(y, 0.0)

    y1 = block(p, params["conv1_w"], params["conv1_b"], params["bn1"])
    y2 = block(y1, params["conv2_w"], params["conv2_b"], params["bn2"])
    return jnp.transpose(y2, (0, 3, 1, 2))


# ---------------------------------- main ------------------------------------


if __name__ == "__main__":
    key = jax.random.PRNGKey(0)
    kx, kp = jax.random.split(key)

    in_channels, out_channels = 4, 8
    x = jax.random.normal(kx, (2, in_channels, 16, 16), jnp.float32)  # NCHW
    params = init_down_params(kp, in_channels, out_channels)

    out = jax.block_until_ready(down_forward(x, params))
    assert out.shape == (2, out_channels, 8, 8), out.shape

    ref = ref_forward(x, params)
    np.testing.assert_allclose(np.asarray(out), np.asarray(ref),
                               rtol=2e-4, atol=2e-5)
    print("KERNEL_OK")
</pallas_src>

<mosaic_0001>
module attributes {stable_mosaic.version = 11 : i64} {
  func.func @down_fused_kernel(%arg0: i32, %arg1: memref<1x8x128xf32, #tpu.memory_space<vmem>>, %arg2: memref<9x4x128xf32, #tpu.memory_space<vmem>>, %arg3: memref<1x128xf32, #tpu.memory_space<vmem>>, %arg4: memref<9x128x128xf32, #tpu.memory_space<vmem>>, %arg5: memref<1x128xf32, #tpu.memory_space<vmem>>, %arg6: memref<1x64x128xf32, #tpu.memory_space<vmem>>) attributes {dimension_semantics = [#tpu.dimension_semantics<parallel>], iteration_bounds = array<i64: 2>, scalar_prefetch = 0 : i64, scratch_operands = 0 : i64, tpu.core_type = #tpu.core_type<tc>, window_params = [{transform_indices = @transform_0, window_bounds = array<i64: 1, 8, 128>}, {pipeline_mode = #tpu.pipeline_mode<synchronous>, transform_indices = @transform_1, window_bounds = array<i64: 9, 4, 128>}, {pipeline_mode = #tpu.pipeline_mode<synchronous>, transform_indices = @transform_2, window_bounds = array<i64: 1, 128>}, {pipeline_mode = #tpu.pipeline_mode<synchronous>, transform_indices = @transform_3, window_bounds = array<i64: 9, 128, 128>}, {pipeline_mode = #tpu.pipeline_mode<synchronous>, transform_indices = @transform_4, window_bounds = array<i64: 1, 128>}, {transform_indices = @transform_5, window_bounds = array<i64: 1, 64, 128>}]} {
    %c0 = arith.constant 0 : index
    %c0_0 = arith.constant 0 : index
    %c0_1 = arith.constant 0 : index
    %0 = vector.load %arg1[%c0, %c0_0, %c0_1] : memref<1x8x128xf32, #tpu.memory_space<vmem>>, vector<1x8x128xf32>
    %1 = vector.shape_cast %0 : vector<1x8x128xf32> to vector<8x128xf32>
    %2 = vector.extract_strided_slice %1 {offsets = [0, 0], sizes = [8, 64], strides = [1, 1]} : vector<8x128xf32> to vector<8x64xf32>
    %3 = vector.extract_strided_slice %1 {offsets = [0, 64], sizes = [8, 64], strides = [1, 1]} : vector<8x128xf32> to vector<8x64xf32>
    %4 = arith.addf %2, %3 : vector<8x64xf32>
    %5 = vector.shape_cast %4 : vector<8x64xf32> to vector<8x8x8xf32>
    %6 = vector.extract_strided_slice %5 {offsets = [0, 0, 0], sizes = [8, 8, 4], strides = [1, 1, 1]} : vector<8x8x8xf32> to vector<8x8x4xf32>
    %7 = vector.extract_strided_slice %5 {offsets = [0, 0, 4], sizes = [8, 8, 4], strides = [1, 1, 1]} : vector<8x8x8xf32> to vector<8x8x4xf32>
    %8 = arith.addf %6, %7 : vector<8x8x4xf32>
    %cst = arith.constant 0.000000e+00 : f32
    %9 = vector.broadcast %cst : f32 to vector<1x8x4xf32>
    %cst_2 = arith.constant 0.000000e+00 : f32
    %10 = vector.broadcast %cst_2 : f32 to vector<10x1x4xf32>
    %11 = tpu.concatenate %9, %8, %9 in 0 : vector<1x8x4xf32>, vector<8x8x4xf32>, vector<1x8x4xf32> -> vector<10x8x4xf32>
    %12 = vector.extract_strided_slice %11 {offsets = [0, 0, 0], sizes = [10, 7, 4], strides = [1, 1, 1]} : vector<10x8x4xf32> to vector<10x7x4xf32>
    %13 = tpu.concatenate %10, %12 in 1 : vector<10x1x4xf32>, vector<10x7x4xf32> -> vector<10x8x4xf32>
    %14 = vector.extract_strided_slice %11 {offsets = [0, 1, 0], sizes = [10, 7, 4], strides = [1, 1, 1]} : vector<10x8x4xf32> to vector<10x7x4xf32>
    %15 = tpu.concatenate %14, %10 in 1 : vector<10x7x4xf32>, vector<10x1x4xf32> -> vector<10x8x4xf32>
    %cst_3 = arith.constant 0.000000e+00 : f32
    %16 = vector.broadcast %cst_3 : f32 to vector<64x128xf32>
    %17 = vector.extract_strided_slice %13 {offsets = [0, 0, 0], sizes = [8, 8, 4], strides = [1, 1, 1]} : vector<10x8x4xf32> to vector<8x8x4xf32>
    %18 = vector.shape_cast %17 : vector<8x8x4xf32> to vector<64x4xf32>
    %c0_4 = arith.constant 0 : index
    %c0_5 = arith.constant 0 : index
    %c0_6 = arith.constant 0 : index
    %19 = vector.load %arg2[%c0_4, %c0_5, %c0_6] : memref<9x4x128xf32, #tpu.memory_space<vmem>>, vector<1x4x128xf32>
    %20 = vector.shape_cast %19 : vector<1x4x128xf32> to vector<4x128xf32>
    %cst_7 = arith.constant dense<0.000000e+00> : vector<64x128xf32>
    %21 = tpu.matmul %18, %20, %cst_7 {dimension_numbers = #tpu.dot_dimension_numbers<[1], [0], [0], [1], [0, 0, 1, 1], [], []>} : vector<64x4xf32>, vector<4x128xf32>, vector<64x128xf32> -> vector<64x128xf32>
    %22 = arith.addf %16, %21 : vector<64x128xf32>
    %23 = vector.extract_strided_slice %11 {offsets = [0, 0, 0], sizes = [8, 8, 4], strides = [1, 1, 1]} : vector<10x8x4xf32> to vector<8x8x4xf32>
    %24 = vector.shape_cast %23 : vector<8x8x4xf32> to vector<64x4xf32>
    %c1 = arith.constant 1 : index
    %c0_8 = arith.constant 0 : index
    %c0_9 = arith.constant 0 : index
    %25 = vector.load %arg2[%c1, %c0_8, %c0_9] : memref<9x4x128xf32, #tpu.memory_space<vmem>>, vector<1x4x128xf32>
    %26 = vector.shape_cast %25 : vector<1x4x128xf32> to vector<4x128xf32>
    %cst_10 = arith.constant dense<0.000000e+00> : vector<64x128xf32>
    %27 = tpu.matmul %24, %26, %cst_10 {dimension_numbers = #tpu.dot_dimension_numbers<[1], [0], [0], [1], [0, 0, 1, 1], [], []>} : vector<64x4xf32>, vector<4x128xf32>, vector<64x128xf32> -> vector<64x128xf32>
    %28 = arith.addf %22, %27 : vector<64x128xf32>
    %29 = vector.extract_strided_slice %15 {offsets = [0, 0, 0], sizes = [8, 8, 4], strides = [1, 1, 1]} : vector<10x8x4xf32> to vector<8x8x4xf32>
    %30 = vector.shape_cast %29 : vector<8x8x4xf32> to vector<64x4xf32>
    %c2 = arith.constant 2 : index
    %c0_11 = arith.constant 0 : index
    %c0_12 = arith.constant 0 : index
    %31 = vector.load %arg2[%c2, %c0_11, %c0_12] : memref<9x4x128xf32, #tpu.memory_space<vmem>>, vector<1x4x128xf32>
    %32 = vector.shape_cast %31 : vector<1x4x128xf32> to vector<4x128xf32>
    %cst_13 = arith.constant dense<0.000000e+00> : vector<64x128xf32>
    %33 = tpu.matmul %30, %32, %cst_13 {dimension_numbers = #tpu.dot_dimension_numbers<[1], [0], [0], [1], [0, 0, 1, 1], [], []>} : vector<64x4xf32>, vector<4x128xf32>, vector<64x128xf32> -> vector<64x128xf32>
    %34 = arith.addf %28, %33 : vector<64x128xf32>
    %35 = vector.extract_strided_slice %13 {offsets = [1, 0, 0], sizes = [8, 8, 4], strides = [1, 1, 1]} : vector<10x8x4xf32> to vector<8x8x4xf32>
    %36 = vector.shape_cast %35 : vector<8x8x4xf32> to vector<64x4xf32>
    %c3 = arith.constant 3 : index
    %c0_14 = arith.constant 0 : index
    %c0_15 = arith.constant 0 : index
    %37 = vector.load %arg2[%c3, %c0_14, %c0_15] : memref<9x4x128xf32, #tpu.memory_space<vmem>>, vector<1x4x128xf32>
    %38 = vector.shape_cast %37 : vector<1x4x128xf32> to vector<4x128xf32>
    %cst_16 = arith.constant dense<0.000000e+00> : vector<64x128xf32>
    %39 = tpu.matmul %36, %38, %cst_16 {dimension_numbers = #tpu.dot_dimension_numbers<[1], [0], [0], [1], [0, 0, 1, 1], [], []>} : vector<64x4xf32>, vector<4x128xf32>, vector<64x128xf32> -> vector<64x128xf32>
    %40 = arith.addf %34, %39 : vector<64x128xf32>
    %41 = vector.extract_strided_slice %11 {offsets = [1, 0, 0], sizes = [8, 8, 4], strides = [1, 1, 1]} : vector<10x8x4xf32> to vector<8x8x4xf32>
    %42 = vector.shape_cast %41 : vector<8x8x4xf32> to vector<64x4xf32>
    %c4 = arith.constant 4 : index
    %c0_17 = arith.constant 0 : index
    %c0_18 = arith.constant 0 : index
    %43 = vector.load %arg2[%c4, %c0_17, %c0_18] : memref<9x4x128xf32, #tpu.memory_space<vmem>>, vector<1x4x128xf32>
    %44 = vector.shape_cast %43 : vector<1x4x128xf32> to vector<4x128xf32>
    %cst_19 = arith.constant dense<0.000000e+00> : vector<64x128xf32>
    %45 = tpu.matmul %42, %44, %cst_19 {dimension_numbers = #tpu.dot_dimension_numbers<[1], [0], [0], [1], [0, 0, 1, 1], [], []>} : vector<64x4xf32>, vector<4x128xf32>, vector<64x128xf32> -> vector<64x128xf32>
    %46 = arith.addf %40, %45 : vector<64x128xf32>
    %47 = vector.extract_strided_slice %15 {offsets = [1, 0, 0], sizes = [8, 8, 4], strides = [1, 1, 1]} : vector<10x8x4xf32> to vector<8x8x4xf32>
    %48 = vector.shape_cast %47 : vector<8x8x4xf32> to vector<64x4xf32>
    %c5 = arith.constant 5 : index
    %c0_20 = arith.constant 0 : index
    %c0_21 = arith.constant 0 : index
    %49 = vector.load %arg2[%c5, %c0_20, %c0_21] : memref<9x4x128xf32, #tpu.memory_space<vmem>>, vector<1x4x128xf32>
    %50 = vector.shape_cast %49 : vector<1x4x128xf32> to vector<4x128xf32>
    %cst_22 = arith.constant dense<0.000000e+00> : vector<64x128xf32>
    %51 = tpu.matmul %48, %50, %cst_22 {dimension_numbers = #tpu.dot_dimension_numbers<[1], [0], [0], [1], [0, 0, 1, 1], [], []>} : vector<64x4xf32>, vector<4x128xf32>, vector<64x128xf32> -> vector<64x128xf32>
    %52 = arith.addf %46, %51 : vector<64x128xf32>
    %53 = vector.extract_strided_slice %13 {offsets = [2, 0, 0], sizes = [8, 8, 4], strides = [1, 1, 1]} : vector<10x8x4xf32> to vector<8x8x4xf32>
    %54 = vector.shape_cast %53 : vector<8x8x4xf32> to vector<64x4xf32>
    %c6 = arith.constant 6 : index
    %c0_23 = arith.constant 0 : index
    %c0_24 = arith.constant 0 : index
    %55 = vector.load %arg2[%c6, %c0_23, %c0_24] : memref<9x4x128xf32, #tpu.memory_space<vmem>>, vector<1x4x128xf32>
    %56 = vector.shape_cast %55 : vector<1x4x128xf32> to vector<4x128xf32>
    %cst_25 = arith.constant dense<0.000000e+00> : vector<64x128xf32>
    %57 = tpu.matmul %54, %56, %cst_25 {dimension_numbers = #tpu.dot_dimension_numbers<[1], [0], [0], [1], [0, 0, 1, 1], [], []>} : vector<64x4xf32>, vector<4x128xf32>, vector<64x128xf32> -> vector<64x128xf32>
    %58 = arith.addf %52, %57 : vector<64x128xf32>
    %59 = vector.extract_strided_slice %11 {offsets = [2, 0, 0], sizes = [8, 8, 4], strides = [1, 1, 1]} : vector<10x8x4xf32> to vector<8x8x4xf32>
    %60 = vector.shape_cast %59 : vector<8x8x4xf32> to vector<64x4xf32>
    %c7 = arith.constant 7 : index
    %c0_26 = arith.constant 0 : index
    %c0_27 = arith.constant 0 : index
    %61 = vector.load %arg2[%c7, %c0_26, %c0_27] : memref<9x4x128xf32, #tpu.memory_space<vmem>>, vector<1x4x128xf32>
    %62 = vector.shape_cast %61 : vector<1x4x128xf32> to vector<4x128xf32>
    %cst_28 = arith.constant dense<0.000000e+00> : vector<64x128xf32>
    %63 = tpu.matmul %60, %62, %cst_28 {dimension_numbers = #tpu.dot_dimension_numbers<[1], [0], [0], [1], [0, 0, 1, 1], [], []>} : vector<64x4xf32>, vector<4x128xf32>, vector<64x128xf32> -> vector<64x128xf32>
    %64 = arith.addf %58, %63 : vector<64x128xf32>
    %65 = vector.extract_strided_slice %15 {offsets = [2, 0, 0], sizes = [8, 8, 4], strides = [1, 1, 1]} : vector<10x8x4xf32> to vector<8x8x4xf32>
    %66 = vector.shape_cast %65 : vector<8x8x4xf32> to vector<64x4xf32>
    %c8 = arith.constant 8 : index
    %c0_29 = arith.constant 0 : index
    %c0_30 = arith.constant 0 : index
    %67 = vector.load %arg2[%c8, %c0_29, %c0_30] : memref<9x4x128xf32, #tpu.memory_space<vmem>>, vector<1x4x128xf32>
    %68 = vector.shape_cast %67 : vector<1x4x128xf32> to vector<4x128xf32>
    %cst_31 = arith.constant dense<0.000000e+00> : vector<64x128xf32>
    %69 = tpu.matmul %66, %68, %cst_31 {dimension_numbers = #tpu.dot_dimension_numbers<[1], [0], [0], [1], [0, 0, 1, 1], [], []>} : vector<64x4xf32>, vector<4x128xf32>, vector<64x128xf32> -> vector<64x128xf32>
    %70 = arith.addf %64, %69 : vector<64x128xf32>
    %c0_32 = arith.constant 0 : index
    %c0_33 = arith.constant 0 : index
    %71 = vector.load %arg3[%c0_32, %c0_33] : memref<1x128xf32, #tpu.memory_space<vmem>>, vector<1x128xf32>
    %72 = vector.broadcast %71 : vector<1x128xf32> to vector<64x128xf32>
    %73 = arith.addf %70, %72 : vector<64x128xf32>
    %cst_34 = arith.constant 0.000000e+00 : f32
    %74 = vector.broadcast %cst_34 : f32 to vector<64x128xf32>
    %75 = arith.maximumf %73, %74 : vector<64x128xf32>
    %76 = vector.shape_cast %75 : vector<64x128xf32> to vector<8x8x128xf32>
    %cst_35 = arith.constant 0.000000e+00 : f32
    %77 = vector.broadcast %cst_35 : f32 to vector<1x8x128xf32>
    %cst_36 = arith.constant 0.000000e+00 : f32
    %78 = vector.broadcast %cst_36 : f32 to vector<10x1x128xf32>
    %79 = tpu.concatenate %77, %76, %77 in 0 : vector<1x8x128xf32>, vector<8x8x128xf32>, vector<1x8x128xf32> -> vector<10x8x128xf32>
    %80 = vector.extract_strided_slice %79 {offsets = [0, 0, 0], sizes = [10, 7, 128], strides = [1, 1, 1]} : vector<10x8x128xf32> to vector<10x7x128xf32>
    %81 = tpu.concatenate %78, %80 in 1 : vector<10x1x128xf32>, vector<10x7x128xf32> -> vector<10x8x128xf32>
    %82 = vector.extract_strided_slice %79 {offsets = [0, 1, 0], sizes = [10, 7, 128], strides = [1, 1, 1]} : vector<10x8x128xf32> to vector<10x7x128xf32>
    %83 = tpu.concatenate %82, %78 in 1 : vector<10x7x128xf32>, vector<10x1x128xf32> -> vector<10x8x128xf32>
    %cst_37 = arith.constant 0.000000e+00 : f32
    %84 = vector.broadcast %cst_37 : f32 to vector<64x128xf32>
    %85 = vector.extract_strided_slice %81 {offsets = [0, 0, 0], sizes = [8, 8, 128], strides = [1, 1, 1]} : vector<10x8x128xf32> to vector<8x8x128xf32>
    %86 = vector.shape_cast %85 : vector<8x8x128xf32> to vector<64x128xf32>
    %c0_38 = arith.constant 0 : index
    %c0_39 = arith.constant 0 : index
    %c0_40 = arith.constant 0 : index
    %87 = vector.load %arg4[%c0_38, %c0_39, %c0_40] : memref<9x128x128xf32, #tpu.memory_space<vmem>>, vector<1x128x128xf32>
    %88 = vector.shape_cast %87 : vector<1x128x128xf32> to vector<128x128xf32>
    %cst_41 = arith.constant dense<0.000000e+00> : vector<64x128xf32>
    %89 = tpu.matmul %86, %88, %cst_41 {dimension_numbers = #tpu.dot_dimension_numbers<[1], [0], [0], [1], [0, 0, 1, 1], [], []>} : vector<64x128xf32>, vector<128x128xf32>, vector<64x128xf32> -> vector<64x128xf32>
    %90 = arith.addf %84, %89 : vector<64x128xf32>
    %91 = vector.extract_strided_slice %79 {offsets = [0, 0, 0], sizes = [8, 8, 128], strides = [1, 1, 1]} : vector<10x8x128xf32> to vector<8x8x128xf32>
    %92 = vector.shape_cast %91 : vector<8x8x128xf32> to vector<64x128xf32>
    %c1_42 = arith.constant 1 : index
    %c0_43 = arith.constant 0 : index
    %c0_44 = arith.constant 0 : index
    %93 = vector.load %arg4[%c1_42, %c0_43, %c0_44] : memref<9x128x128xf32, #tpu.memory_space<vmem>>, vector<1x128x128xf32>
    %94 = vector.shape_cast %93 : vector<1x128x128xf32> to vector<128x128xf32>
    %cst_45 = arith.constant dense<0.000000e+00> : vector<64x128xf32>
    %95 = tpu.matmul %92, %94, %cst_45 {dimension_numbers = #tpu.dot_dimension_numbers<[1], [0], [0], [1], [0, 0, 1, 1], [], []>} : vector<64x128xf32>, vector<128x128xf32>, vector<64x128xf32> -> vector<64x128xf32>
    %96 = arith.addf %90, %95 : vector<64x128xf32>
    %97 = vector.extract_strided_slice %83 {offsets = [0, 0, 0], sizes = [8, 8, 128], strides = [1, 1, 1]} : vector<10x8x128xf32> to vector<8x8x128xf32>
    %98 = vector.shape_cast %97 : vector<8x8x128xf32> to vector<64x128xf32>
    %c2_46 = arith.constant 2 : index
    %c0_47 = arith.constant 0 : index
    %c0_48 = arith.constant 0 : index
    %99 = vector.load %arg4[%c2_46, %c0_47, %c0_48] : memref<9x128x128xf32, #tpu.memory_space<vmem>>, vector<1x128x128xf32>
    %100 = vector.shape_cast %99 : vector<1x128x128xf32> to vector<128x128xf32>
    %cst_49 = arith.constant dense<0.000000e+00> : vector<64x128xf32>
    %101 = tpu.matmul %98, %100, %cst_49 {dimension_numbers = #tpu.dot_dimension_numbers<[1], [0], [0], [1], [0, 0, 1, 1], [], []>} : vector<64x128xf32>, vector<128x128xf32>, vector<64x128xf32> -> vector<64x128xf32>
    %102 = arith.addf %96, %101 : vector<64x128xf32>
    %103 = vector.extract_strided_slice %81 {offsets = [1, 0, 0], sizes = [8, 8, 128], strides = [1, 1, 1]} : vector<10x8x128xf32> to vector<8x8x128xf32>
    %104 = vector.shape_cast %103 : vector<8x8x128xf32> to vector<64x128xf32>
    %c3_50 = arith.constant 3 : index
    %c0_51 = arith.constant 0 : index
    %c0_52 = arith.constant 0 : index
    %105 = vector.load %arg4[%c3_50, %c0_51, %c0_52] : memref<9x128x128xf32, #tpu.memory_space<vmem>>, vector<1x128x128xf32>
    %106 = vector.shape_cast %105 : vector<1x128x128xf32> to vector<128x128xf32>
    %cst_53 = arith.constant dense<0.000000e+00> : vector<64x128xf32>
    %107 = tpu.matmul %104, %106, %cst_53 {dimension_numbers = #tpu.dot_dimension_numbers<[1], [0], [0], [1], [0, 0, 1, 1], [], []>} : vector<64x128xf32>, vector<128x128xf32>, vector<64x128xf32> -> vector<64x128xf32>
    %108 = arith.addf %102, %107 : vector<64x128xf32>
    %109 = vector.extract_strided_slice %79 {offsets = [1, 0, 0], sizes = [8, 8, 128], strides = [1, 1, 1]} : vector<10x8x128xf32> to vector<8x8x128xf32>
    %110 = vector.shape_cast %109 : vector<8x8x128xf32> to vector<64x128xf32>
    %c4_54 = arith.constant 4 : index
    %c0_55 = arith.constant 0 : index
    %c0_56 = arith.constant 0 : index
    %111 = vector.load %arg4[%c4_54, %c0_55, %c0_56] : memref<9x128x128xf32, #tpu.memory_space<vmem>>, vector<1x128x128xf32>
    %112 = vector.shape_cast %111 : vector<1x128x128xf32> to vector<128x128xf32>
    %cst_57 = arith.constant dense<0.000000e+00> : vector<64x128xf32>
    %113 = tpu.matmul %110, %112, %cst_57 {dimension_numbers = #tpu.dot_dimension_numbers<[1], [0], [0], [1], [0, 0, 1, 1], [], []>} : vector<64x128xf32>, vector<128x128xf32>, vector<64x128xf32> -> vector<64x128xf32>
    %114 = arith.addf %108, %113 : vector<64x128xf32>
    %115 = vector.extract_strided_slice %83 {offsets = [1, 0, 0], sizes = [8, 8, 128], strides = [1, 1, 1]} : vector<10x8x128xf32> to vector<8x8x128xf32>
    %116 = vector.shape_cast %115 : vector<8x8x128xf32> to vector<64x128xf32>
    %c5_58 = arith.constant 5 : index
    %c0_59 = arith.constant 0 : index
    %c0_60 = arith.constant 0 : index
    %117 = vector.load %arg4[%c5_58, %c0_59, %c0_60] : memref<9x128x128xf32, #tpu.memory_space<vmem>>, vector<1x128x128xf32>
    %118 = vector.shape_cast %117 : vector<1x128x128xf32> to vector<128x128xf32>
    %cst_61 = arith.constant dense<0.000000e+00> : vector<64x128xf32>
    %119 = tpu.matmul %116, %118, %cst_61 {dimension_numbers = #tpu.dot_dimension_numbers<[1], [0], [0], [1], [0, 0, 1, 1], [], []>} : vector<64x128xf32>, vector<128x128xf32>, vector<64x128xf32> -> vector<64x128xf32>
    %120 = arith.addf %114, %119 : vector<64x128xf32>
    %121 = vector.extract_strided_slice %81 {offsets = [2, 0, 0], sizes = [8, 8, 128], strides = [1, 1, 1]} : vector<10x8x128xf32> to vector<8x8x128xf32>
    %122 = vector.shape_cast %121 : vector<8x8x128xf32> to vector<64x128xf32>
    %c6_62 = arith.constant 6 : index
    %c0_63 = arith.constant 0 : index
    %c0_64 = arith.constant 0 : index
    %123 = vector.load %arg4[%c6_62, %c0_63, %c0_64] : memref<9x128x128xf32, #tpu.memory_space<vmem>>, vector<1x128x128xf32>
    %124 = vector.shape_cast %123 : vector<1x128x128xf32> to vector<128x128xf32>
    %cst_65 = arith.constant dense<0.000000e+00> : vector<64x128xf32>
    %125 = tpu.matmul %122, %124, %cst_65 {dimension_numbers = #tpu.dot_dimension_numbers<[1], [0], [0], [1], [0, 0, 1, 1], [], []>} : vector<64x128xf32>, vector<128x128xf32>, vector<64x128xf32> -> vector<64x128xf32>
    %126 = arith.addf %120, %125 : vector<64x128xf32>
    %127 = vector.extract_strided_slice %79 {offsets = [2, 0, 0], sizes = [8, 8, 128], strides = [1, 1, 1]} : vector<10x8x128xf32> to vector<8x8x128xf32>
    %128 = vector.shape_cast %127 : vector<8x8x128xf32> to vector<64x128xf32>
    %c7_66 = arith.constant 7 : index
    %c0_67 = arith.constant 0 : index
    %c0_68 = arith.constant 0 : index
    %129 = vector.load %arg4[%c7_66, %c0_67, %c0_68] : memref<9x128x128xf32, #tpu.memory_space<vmem>>, vector<1x128x128xf32>
    %130 = vector.shape_cast %129 : vector<1x128x128xf32> to vector<128x128xf32>
    %cst_69 = arith.constant dense<0.000000e+00> : vector<64x128xf32>
    %131 = tpu.matmul %128, %130, %cst_69 {dimension_numbers = #tpu.dot_dimension_numbers<[1], [0], [0], [1], [0, 0, 1, 1], [], []>} : vector<64x128xf32>, vector<128x128xf32>, vector<64x128xf32> -> vector<64x128xf32>
    %132 = arith.addf %126, %131 : vector<64x128xf32>
    %133 = vector.extract_strided_slice %83 {offsets = [2, 0, 0], sizes = [8, 8, 128], strides = [1, 1, 1]} : vector<10x8x128xf32> to vector<8x8x128xf32>
    %134 = vector.shape_cast %133 : vector<8x8x128xf32> to vector<64x128xf32>
    %c8_70 = arith.constant 8 : index
    %c0_71 = arith.constant 0 : index
    %c0_72 = arith.constant 0 : index
    %135 = vector.load %arg4[%c8_70, %c0_71, %c0_72] : memref<9x128x128xf32, #tpu.memory_space<vmem>>, vector<1x128x128xf32>
    %136 = vector.shape_cast %135 : vector<1x128x128xf32> to vector<128x128xf32>
    %cst_73 = arith.constant dense<0.000000e+00> : vector<64x128xf32>
    %137 = tpu.matmul %134, %136, %cst_73 {dimension_numbers = #tpu.dot_dimension_numbers<[1], [0], [0], [1], [0, 0, 1, 1], [], []>} : vector<64x128xf32>, vector<128x128xf32>, vector<64x128xf32> -> vector<64x128xf32>
    %138 = arith.addf %132, %137 : vector<64x128xf32>
    %c0_74 = arith.constant 0 : index
    %c0_75 = arith.constant 0 : index
    %139 = vector.load %arg5[%c0_74, %c0_75] : memref<1x128xf32, #tpu.memory_space<vmem>>, vector<1x128xf32>
    %140 = vector.broadcast %139 : vector<1x128xf32> to vector<64x128xf32>
    %141 = arith.addf %138, %140 : vector<64x128xf32>
    %cst_76 = arith.constant 0.000000e+00 : f32
    %142 = vector.broadcast %cst_76 : f32 to vector<64x128xf32>
    %143 = arith.maximumf %141, %142 : vector<64x128xf32>
    %144 = vector.shape_cast %143 : vector<64x128xf32> to vector<1x64x128xf32>
    %c0_77 = arith.constant 0 : index
    %c0_78 = arith.constant 0 : index
    %c0_79 = arith.constant 0 : index
    %145 = vector.load %arg6[%c0_77, %c0_78, %c0_79] : memref<1x64x128xf32, #tpu.memory_space<vmem>>, vector<1x64x128xf32>
    tpu.vector_store %arg6[%c0_77, %c0_78, %c0_79], %144 {strides = array<i32>} : memref<1x64x128xf32, #tpu.memory_space<vmem>>, vector<1x64x128xf32>,
    return
  }
  func.func @transform_0(%arg0: i32) -> (i32, i32, i32) {
    %c0_i32 = arith.constant 0 : i32
    %c0_i32_0 = arith.constant 0 : i32
    %c0_i32_1 = arith.constant 0 : i32
    return %arg0, %c0_i32, %c0_i32_0 : i32, i32, i32
  }
  func.func @transform_1(%arg0: i32) -> (i32, i32, i32) {
    %c0_i32 = arith.constant 0 : i32
    %c0_i32_0 = arith.constant 0 : i32
    %c0_i32_1 = arith.constant 0 : i32
    %c0_i32_2 = arith.constant 0 : i32
    return %c0_i32, %c0_i32_0, %c0_i32_1 : i32, i32, i32
  }
  func.func @transform_2(%arg0: i32) -> (i32, i32) {
    %c0_i32 = arith.constant 0 : i32
    %c0_i32_0 = arith.constant 0 : i32
    %c0_i32_1 = arith.constant 0 : i32
    return %c0_i32, %c0_i32_0 : i32, i32
  }
  func.func @transform_3(%arg0: i32) -> (i32, i32, i32) {
    %c0_i32 = arith.constant 0 : i32
    %c0_i32_0 = arith.constant 0 : i32
    %c0_i32_1 = arith.constant 0 : i32
    %c0_i32_2 = arith.constant 0 : i32
    return %c0_i32, %c0_i32_0, %c0_i32_1 : i32, i32, i32
  }
  func.func @transform_4(%arg0: i32) -> (i32, i32) {
    %c0_i32 = arith.constant 0 : i32
    %c0_i32_0 = arith.constant 0 : i32
    %c0_i32_1 = arith.constant 0 : i32
    return %c0_i32, %c0_i32_0 : i32, i32
  }
  func.func @transform_5(%arg0: i32) -> (i32, i32, i32) {
    %c0_i32 = arith.constant 0 : i32
    %c0_i32_0 = arith.constant 0 : i32
    %c0_i32_1 = arith.constant 0 : i32
    return %arg0, %c0_i32, %c0_i32_0 : i32, i32, i32
  }
}

</mosaic_0001>

<bundles_post_ra>
// kernel: down_forward.1
= control target key start
LH: loop header
LB: loop body
LE: loop exit
PB: predicated region body
PF: predicated region fallthrough
CT: control target
= control target key end

     0   :  { %s4549_s18 = smov 0   ;;  %s5555_s0 = inlined_call_operand.vmem [shape: f32[2,8,128], index: 0, kind: input, shape index: {}]   ;;  %s5556_s1 = inlined_call_operand.vmem [shape: f32[9,4,128], index: 1, kind: input, shape index: {}]   ;;  %s5557_s2 = inlined_call_operand.vmem [shape: f32[1,128], index: 2, kind: input, shape index: {}]   ;;  %s5558_s3 = inlined_call_operand.vmem [shape: f32[9,128,128], index: 3, kind: input, shape index: {}]   ;;  %s5559_s4 = inlined_call_operand.vmem [shape: f32[1,128], index: 4, kind: input, shape index: {}]   ;;  %s5560_s5 = inlined_call_operand.vmem [shape: f32[2,64,128], index: 5, kind: output, shape index: {}]  }
   0x1 LB: > { %s2928_s19 = sadd.s32 4294967295, %s4505_s18   ;;  %p2932_p0 = scmp.ge.s32.totalorder %s4505_s18, 1  ;;  %s4505_s18 = sphi %s4549_s18, %s15_s18  }
   0x2   : > { %p186_p1 = scmp.lt.s32.totalorder %s4505_s18, 3 }
   0x4   : > { %p187_p2 = pnand %p2932_p0, %p186_p1 }
   0x5   : > { %p213_p3 = scmp.lt.s32.totalorder (!%p187_p2), %s2928_s19, 1  ;;  %s4507_s24 = smov (!%p187_p2), 64   ;;  %v2936_v3 = vld [vmem:[%s5556_s1 + $0x4] sm:$0xf] (!%p187_p2)  ;;  %vm511_vm0 = vcmask (!%p187_p2), 1043456   ;;  %v255_v8 = vlaneseq (!%p187_p2)  ;;  %v4517_v28 = vmov (!%p187_p2), 0.0  }
   0x6   : > { %190 = sbr.rel (%p187_p2) target bundleno = 1155 (0x483), region = 40  ;;  %s4508_s25 = smov (!%p187_p2), 112   ;;  %3525 = vmatprep.subr.msk.mxu0 (!%p187_p2), %vm511_vm0, %v2936_v3  ;;  %v4515_v6 = vmov (!%p187_p2), 1983009808   ;;  %v4516_v13 = vmov (!%p187_p2), 1934713408   ;;  %3527 = vmatprep.mubr.f32.mxu0 (!%p187_p2), %v4517_v28 }
   0x7   : > { %s4509_s26 = smov (!%p187_p2), 120   ;;  %s4510_s27 = smov (!%p187_p2), 104   ;;  %3526 = vmatpush3.msk.msra.mxu0 (!%p187_p2), %vm511_vm0, %v2936_v3  ;;  %v253_v7 = vunpack.c.l.s4 (!%p187_p2), %v4515_v6  ;;  %v256_v12 = vshrl.u32 (!%p187_p2), %v255_v8, 7  ;;  %v317_v14 = vunpack.c.l.s4 (!%p187_p2), %v4516_v13  ;;  %v491_v24 = vld [vmem:[%s5556_s1] sm:$0xf] (!%p187_p2)  ;;  %v4577_v63 = vrot.slane (!%p187_p2), %v4517_v28, 1 }
   0x8   : > { %s4511_s28 = smov (!%p187_p2), 96   ;;  %s4512_s29 = smov (!%p187_p2), 88   ;;  %3539 = vmatprep.subr.msk.mxu0 (!%p187_p2), %vm511_vm0, %v491_v24  ;;  %vm481_vm1 = vcmask (!%p187_p2), 1046528   ;;  %vm494_vm2 = vcmask (!%p187_p2), 31744   ;;  %v4607_v13 = vrot.slane (!%p187_p2), %v4517_v28, 7  ;;  %vm453_vm3 = vcmask (!%p187_p2), 1040384  }
   0x9   : > { %s4513_s30 = smov (!%p187_p2), 80   ;;  %s4514_s6 = smov (!%p187_p2), 72   ;;  %v254_v11 = vunpack.c.0.s8 (!%p187_p2), %v253_v7  ;;  %v318_v20 = vunpack.c.0.s8 (!%p187_p2), %v317_v14  ;;  %3771 = vmatprep.mubr.msk.f32.mxu1 (!%p187_p2), %vm481_vm1, %v4577_v63  ;;  %vm5059_vm4 = vmneg (!%p187_p2), %vm453_vm3 }
   0xa   : > { %s4518_s11 = smov (!%p187_p2), 124  }
   0xb   : > { %v257_v18 = vsub.s32 (!%p187_p2), %v254_v11, %v256_v12  ;;  %v321_v30 = vsub.s32 (!%p187_p2), %v318_v20, %v256_v12  ;;  %v3057_v20 = vld [vmem:[%s5558_s3 + $0x108] sm:$0xff] (!%p187_p2) }
   0xd   : > { %s5564_s19 = smov (!%p213_p3, %s2928_s19), 1 }
   0xe   : > { %s2933_s20 = sshll.u32 %s5564_s19, 3  ;;  %s3227_s21 = sshll.u32 %s5564_s19, 6 }
   0xf   : > { %s216_s23 = scalar_lea.vmem %s5555_s0, %s2933_s20 }
  0x10   : > { %v222_v0 = vld [vmem:[%s216_s23] sm:$0xff] }
  0x11   : > { %224 = vrot.lane.b32.xlu0 %v222_v0, %s4507_s24  ;;  %s5542_s24 = scalar_lea.vmem %s5560_s5, %s3227_s21 }
  0x83   : > { %v225_v1 = vpop.permute.xlu0 %224 }
  0x84   : > { %v227_v2 = vadd.f32 %v225_v1, %v222_v0 }
  0x86   : > { %232 = vrot.lane.b32.xlu1 %v227_v2, %s4508_s25  ;;  %229 = vrot.lane.b32.xlu0 %v227_v2, %s4509_s26 }
  0x8a   : > { %235 = vrot.lane.b32.xlu1 %v227_v2, %s4510_s27  ;;  %238 = vrot.lane.b32.xlu0 %v227_v2, %s4511_s28 }
  0x8e   : > { %241 = vrot.lane.b32.xlu1 %v227_v2, %s4512_s29  ;;  %244 = vrot.lane.b32.xlu0 %v227_v2, %s4513_s30 }
  0x92   : > { %247 = vrot.lane.b32.xlu1 %v227_v2, %s4514_s6 }
  0xf8   : > { %v233_v4 = vpop.permute.xlu1 %232  ;;  %v230_v5 = vpop.permute.xlu0 %229 }
  0xf9   : > { %v250_v19 = vcombine.low %v227_v2, %v233_v4  ;;  %v251_v35 = vcombine.high %v227_v2, %v233_v4  ;;  %v2954_v4 = vld [vmem:[%s5556_s1 + $0x8] sm:$0xf] }
  0xfb   : > { %v258_v25 = vrot.slane %v250_v19, %v257_v18  ;;  %v265_v44 = vrot.slane %v251_v35, %v257_v18  ;;  %v3056_v19 = vld [vmem:[%s5558_s3 + $0x100] sm:$0xff] }
  0xfc   : > { %v236_v9 = vpop.permute.xlu1 %235  ;;  %v239_v10 = vpop.permute.xlu0 %238 }
  0xfd   : > { %v266_v15 = vcombine.low %v230_v5, %v236_v9  ;;  %v267_v29 = vcombine.high %v230_v5, %v236_v9 }
  0xff   : > { %v274_v21 = vrot.slane %v266_v15, %v257_v18  ;;  %v281_v39 = vrot.slane %v267_v29, %v257_v18 }
 0x100   : > { %v242_v16 = vpop.permute.xlu1 %241  ;;  %v245_v17 = vpop.permute.xlu0 %244 }
 0x101   : > { %v282_v22 = vcombine.low %v239_v10, %v245_v17  ;;  %v314_v31 = vcombine.low %v258_v25, %v274_v21  ;;  %v283_v32 = vcombine.high %v239_v10, %v245_v17  ;;  %v315_v40 = vcombine.high %v258_v25, %v274_v21  ;;  %v3058_v21 = vld [vmem:[%s5558_s3 + $0x110] sm:$0xff] }
 0x102   : > { %v330_v49 = vcombine.low %v265_v44, %v281_v39  ;;  %v331_v55 = vcombine.high %v265_v44, %v281_v39  ;;  %v4111_v25 = vpack.c.bf16 %v3057_v20, %v3056_v19  ;;  %v3063_v39 = vld [vmem:[%s5558_s3 + $0x138] sm:$0xff]  ;;  %v3064_v44 = vld [vmem:[%s5558_s3 + $0x140] sm:$0xff] }
 0x103   : > { %v290_v33 = vrot.slane %v282_v22, %v257_v18  ;;  %v297_v41 = vrot.slane %v283_v32, %v257_v18  ;;  %v322_v42 = vrot.slane %v314_v31, %v321_v30  ;;  %v329_v50 = vrot.slane %v315_v40, %v321_v30  ;;  %v3060_v31 = vld [vmem:[%s5558_s3 + $0x120] sm:$0xff]  ;;  %v3061_v32 = vld [vmem:[%s5558_s3 + $0x128] sm:$0xff] }
 0x104   : > { %v248_v23 = vpop.permute.xlu1 %247  ;;  %v338_v56 = vrot.slane %v330_v49, %v321_v30  ;;  %v345_v60 = vrot.slane %v331_v55, %v321_v30  ;;  %4112 = vmatprep.subr.bf16.mxu1 %v4111_v25  ;;  %v2974_v55 = vld [vmem:[%s5556_s1 + $0x10] sm:$0xf] }
 0x105   : > { %v298_v26 = vcombine.low %v242_v16, %v248_v23  ;;  %v299_v27 = vcombine.high %v242_v16, %v248_v23  ;;  %v4617_v16 = vsel %vm453_vm3, 0.0, %v4607_v13  ;;  %4114 = vmatpush3.bf16.msra.mxu1 %v4111_v25  ;;  %v3024_v25 = vld [vmem:[%s5558_s3 + $0x80] sm:$0xff] }
 0x107   : > { %v306_v34 = vrot.slane %v298_v26, %v257_v18  ;;  %v313_v36 = vrot.slane %v299_v27, %v257_v18  ;;  %v3059_v26 = vld [vmem:[%s5558_s3 + $0x118] sm:$0xff] }
 0x109   : > { %v346_v37 = vcombine.low %v290_v33, %v306_v34  ;;  %v347_v38 = vcombine.high %v290_v33, %v306_v34  ;;  %v362_v45 = vcombine.low %v297_v41, %v313_v36  ;;  %v363_v51 = vcombine.high %v297_v41, %v313_v36 }
 0x10b   : > { %v354_v43 = vrot.slane %v346_v37, %v321_v30  ;;  %v361_v48 = vrot.slane %v347_v38, %v321_v30  ;;  %v370_v54 = vrot.slane %v362_v45, %v321_v30  ;;  %v377_v59 = vrot.slane %v363_v51, %v321_v30  ;;  %v3062_v38 = vld [vmem:[%s5558_s3 + $0x130] sm:$0xff]  ;;  %v3065_v45 = vld [vmem:[%s5558_s3 + $0x148] sm:$0xff] }
 0x10c   : > { %v4115_v30 = vpack.c.bf16 %v3059_v26, %v3058_v21  ;;  %v4119_v37 = vpack.c.bf16 %v3061_v32, %v3060_v31  ;;  %v3066_v51 = vld [vmem:[%s5558_s3 + $0x150] sm:$0xff]  ;;  %v3025_v26 = vld [vmem:[%s5558_s3 + $0x88] sm:$0xff]  ;;  %v3032_v31 = vld [vmem:[%s5558_s3 + $0xc0] sm:$0xff] }
 0x10d   : > { %v379_v46 = vcombine.high %v322_v42, %v354_v43  ;;  %v378_v47 = vcombine.low %v322_v42, %v354_v43  ;;  %v381_v52 = vcombine.high %v329_v50, %v361_v48  ;;  %v380_v53 = vcombine.low %v329_v50, %v361_v48  ;;  %v3033_v32 = vld [vmem:[%s5558_s3 + $0xc8] sm:$0xff] }
 0x10e   : > { %v383_v57 = vcombine.high %v338_v56, %v370_v54  ;;  %v382_v58 = vcombine.low %v338_v56, %v370_v54  ;;  %v4573_v61 = vcombine.high %v345_v60, %v377_v59  ;;  %v384_v62 = vcombine.low %v345_v60, %v377_v59  ;;  %4116 = vmatprep.subr.bf16.mxu1 %v4115_v30  ;;  %v3068_v59 = vld [vmem:[%s5558_s3 + $0x160] sm:$0xff]  ;;  %v3069_v60 = vld [vmem:[%s5558_s3 + $0x168] sm:$0xff] }
 0x10f   : > { %396 = vrot.lane.b32.xlu1 %v379_v46, %s4518_s11  ;;  %394 = vrot.lane.b32.xlu0 %v378_v47, %s4518_s11  ;;  %v4123_v43 = vpack.c.bf16 %v3063_v39, %v3062_v38  ;;  %v4127_v50 = vpack.c.bf16 %v3065_v45, %v3064_v44  ;;  %v3037_v38 = vld [vmem:[%s5558_s3 + $0xe8] sm:$0xff]  ;;  %v3071_v44 = vld [vmem:[%s5558_s3 + $0x178] sm:$0xff] }
 0x110   : > { %4118 = vmatpush3.bf16.msra.mxu1 %v4115_v30 }
 0x111   : > { %4120 = vmatprep.subr.bf16.mxu1 %v4119_v37 }
 0x113   : > { %400 = vrot.lane.b32.xlu1 %v381_v52, %s4518_s11  ;;  %398 = vrot.lane.b32.xlu0 %v380_v53, %s4518_s11 }
 0x114   : > { %4122 = vmatpush3.bf16.msra.mxu1 %v4119_v37  ;;  %v3036_v37 = vld [vmem:[%s5558_s3 + $0xe0] sm:$0xff] }
 0x115   : > { %4124 = vmatprep.subr.bf16.mxu1 %v4123_v43  ;;  %v4071_v39 = vpack.c.bf16 %v3037_v38, %v3036_v37 }
 0x117   : > { %404 = vrot.lane.b32.xlu1 %v383_v57, %s4518_s11  ;;  %402 = vrot.lane.b32.xlu0 %v382_v58, %s4518_s11 }
 0x118   : > { %4126 = vmatpush3.bf16.msra.mxu1 %v4123_v43  ;;  %v3070_v43 = vld [vmem:[%s5558_s3 + $0x170] sm:$0xff] }
 0x119   : > { %4128 = vmatprep.subr.bf16.mxu1 %v4127_v50  ;;  %v4139_v45 = vpack.c.bf16 %v3071_v44, %v3070_v43  ;;  %v1699_v43 = vld [vmem:[%s5558_s3 + $0x50] sm:$0xff]  ;;  %v1700_v44 = vld [vmem:[%s5558_s3 + $0x58] sm:$0xff] }
 0x11b   : > { %408 = vrot.lane.b32.xlu1 %v4573_v61, %s4518_s11  ;;  %406 = vrot.lane.b32.xlu0 %v384_v62, %s4518_s11 }
 0x11c   : > { %4130 = vmatpush3.bf16.msra.mxu1 %v4127_v50  ;;  %v3081_v50 = vld [vmem:[%s5558_s3 + $0x188] sm:$0xff] }
 0x181   : > { %v397_v0 = vpop.permute.xlu1 %396  ;;  %v395_v1 = vpop.permute.xlu0 %394 }
 0x182   : > { %v4581_v2 = vadd.f32 %v397_v0, %v379_v46  ;;  %v4583_v3 = vadd.f32 %v395_v1, %v378_v47  ;;  %v4697_v46 = vsel %vm481_vm1, %v4577_v63, 0.0 }
 0x184   : > { %3528 = vmatmul.mubr.msk.f32.vlgmr.msra.gmra.mrb[0].mxu0 %vm494_vm2, %v4583_v3  ;;  %v436_v17 = vrot.slane %v4583_v3, 7  ;;  %v437_v18 = vrot.slane %v4581_v2, 7  ;;  %v464_v47 = vrot.slane %v4583_v3, 1  ;;  %v465_v49 = vrot.slane %v4581_v2, 1 }
 0x185   : > { %3540 = vmatpush3.msk.msra.mxu0 %vm511_vm0, %v491_v24  ;;  %v401_v5 = vpop.permute.xlu1 %400  ;;  %3530 = vmatprep.mubr.msk.f32.mxu0 %vm494_vm2, %v4581_v2  ;;  %v399_v6 = vpop.permute.xlu0 %398  ;;  %v2964_v24 = vld [vmem:[%s5556_s1 + $0xc] sm:$0xf] }
 0x186   : > { %v4593_v7 = vadd.f32 %v401_v5, %v381_v52  ;;  %v4595_v8 = vadd.f32 %v399_v6, %v380_v53  ;;  %3553 = vmatprep.subr.msk.mxu0 %vm511_vm0, %v2954_v4  ;;  %v4635_v22 = vsel %vm453_vm3, 0.0, %v436_v17  ;;  %v4647_v27 = vsel %vm453_vm3, 0.0, %v437_v18  ;;  %v3067_v52 = vld [vmem:[%s5558_s3 + $0x158] sm:$0xff]  ;;  %v2984_v17 = vld [vmem:[%s5556_s1 + $0x14] sm:$0xf] }
 0x187   : > { %v483_v53 = vsel %vm481_vm1, %v464_v47, 0.0  ;;  %v4721_v56 = vsel %vm481_vm1, %v465_v49, 0.0  ;;  %v4135_v5 = vpack.c.bf16 %v3069_v60, %v3068_v59  ;;  %v1690_v47 = vld [vmem:[%s5558_s3 + $0x8] sm:$0xff]  ;;  %v3080_v49 = vld [vmem:[%s5558_s3 + $0x180] sm:$0xff]  ;;  %v3082_v60 = vld [vmem:[%s5558_s3 + $0x190] sm:$0xff] }
 0x188   : > { %3531 = vmatmul.mubr.msk.f32.gmra.mrb[2].mxu0 %vm494_vm2, %v4595_v8  ;;  %v438_v23 = vrot.slane %v4595_v8, 7  ;;  %v439_v29 = vrot.slane %v4593_v7, 7  ;;  %v466_v54 = vrot.slane %v4595_v8, 1 }
 0x189   : > { %v405_v9 = vpop.permute.xlu1 %404  ;;  %3533 = vmatprep.mubr.msk.f32.mxu0 %vm494_vm2, %v4593_v7  ;;  %v403_v10 = vpop.permute.xlu0 %402 }
 0x18a   : > { %v4602_v11 = vadd.f32 %v405_v9, %v383_v57  ;;  %v4604_v12 = vadd.f32 %v403_v10, %v382_v58  ;;  %v4661_v33 = vsel %vm453_vm3, 0.0, %v438_v23  ;;  %v4667_v35 = vsel %vm453_vm3, 0.0, %v439_v29  ;;  %v3031_v29 = vld [vmem:[%s5558_s3 + $0xb8] sm:$0xff] }
 0x18b   : > { %v467_v57 = vrot.slane %v4593_v7, 1  ;;  %v4131_v58 = vpack.c.bf16 %v3067_v52, %v3066_v51  ;;  %v4143_v51 = vpack.c.bf16 %v3081_v50, %v3080_v49  ;;  %v4944_v52 = vld [vmem:[%s5557_s2] ss:$0 sm:$0xff]  ;;  %v3090_v49 = vld [vmem:[%s5558_s3 + $0x1d0] sm:$0xff]  ;;  %v3091_v50 = vld [vmem:[%s5558_s3 + $0x1d8] sm:$0xff] }
 0x18c   : > { %3534 = vmatmul.mubr.msk.f32.gmra.mrb[4].mxu0 %vm494_vm2, %v4604_v12  ;;  %v440_v34 = vrot.slane %v4604_v12, 7  ;;  %v441_v36 = vrot.slane %v4602_v11, 7  ;;  %v468_v0 = vrot.slane %v4604_v12, 1 }
 0x18d   : > { %3536 = vmatprep.mubr.msk.f32.mxu0 %vm494_vm2, %v4602_v11  ;;  %v407_v14 = vpop.permute.xlu0 %406  ;;  %v4741_v1 = vsel %vm481_vm1, %v467_v57, 0.0  ;;  %4132 = vmatprep.subr.bf16.mxu1 %v4131_v58  ;;  %v409_v18 = vpop.permute.xlu1 %408  ;;  %v1692_v57 = vld [vmem:[%s5558_s3 + $0x18] sm:$0xff] }
 0x18e   : > { %v4613_v15 = vadd.f32 %v407_v14, %v384_v62  ;;  %v4679_v40 = vsel %vm453_vm3, 0.0, %v440_v34  ;;  %v4685_v42 = vsel %vm453_vm3, 0.0, %v441_v36  ;;  %v4735_v62 = vsel %vm481_vm1, %v466_v54, 0.0  ;;  %4134 = vmatpush3.bf16.msra.mxu1 %v4131_v58  ;;  %v3034_v34 = vld [vmem:[%s5558_s3 + $0xd0] sm:$0xff] }
 0x18f   : > { %v4747_v6 = vsel %vm481_vm1, %v468_v0, 0.0  ;;  %4136 = vmatprep.subr.bf16.mxu1 %v4135_v5  ;;  %v425_v19 = vadd.f32 %v409_v18, %v4573_v61  ;;  %v2994_v61 = vld [vmem:[%s5556_s1 + $0x18] sm:$0xf] }
 0x190   : > { %3537 = vmatmul.mubr.msk.f32.gmra.mrb[6].mxu0 %vm494_vm2, %v4613_v15  ;;  %v442_v41 = vrot.slane %v4613_v15, 7  ;;  %v470_v9 = vrot.slane %v4613_v15, 1 }
 0x191   : > { %3541 = vmatprep.mubr.msk.f32.mxu0 %vm494_vm2, %v4617_v16  ;;  %v443_v20 = vrot.slane %v425_v19, 7 }
 0x192   : > { %v4701_v48 = vsel %vm453_vm3, 0.0, %v442_v41  ;;  %v4758_v14 = vsel %vm481_vm1, %v470_v9, 0.0  ;;  %4138 = vmatpush3.bf16.msra.mxu1 %v4135_v5  ;;  %v3039_v41 = vld [vmem:[%s5558_s3 + $0xf8] sm:$0xff]  ;;  %v1693_v9 = vld [vmem:[%s5558_s3 + $0x20] sm:$0xff] }
 0x193   : > { %v462_v21 = vsel %vm453_vm3, 0.0, %v443_v20  ;;  %4140 = vmatprep.subr.bf16.mxu1 %v4139_v45 }
 0x194   : > { %3542 = vmatmul.mubr.msk.f32.vlgmr.msra.gmra.mrb[0].mxu0 %vm494_vm2, %v4635_v22 }
 0x195   : > { %3554 = vmatpush3.msk.msra.mxu0 %vm511_vm0, %v2954_v4  ;;  %3544 = vmatprep.mubr.msk.f32.mxu0 %vm494_vm2, %v4647_v27  ;;  %v469_v4 = vrot.slane %v4602_v11, 1 }
 0x196   : > { %3567 = vmatprep.subr.msk.mxu0 %vm511_vm0, %v2964_v24  ;;  %4142 = vmatpush3.bf16.msra.mxu1 %v4139_v45 }
 0x197   : > { %v4753_v10 = vsel %vm481_vm1, %v469_v4, 0.0  ;;  %4144 = vmatprep.subr.bf16.mxu1 %v4143_v51 }
 0x198   : > { %3545 = vmatmul.mubr.msk.f32.gmra.mrb[2].mxu0 %vm494_vm2, %v4661_v33 }
 0x199   : > { %3547 = vmatprep.mubr.msk.f32.mxu0 %vm494_vm2, %v4667_v35 }
 0x19c   : > { %3548 = vmatmul.mubr.msk.f32.gmra.mrb[4].mxu0 %vm494_vm2, %v4679_v40 }
 0x19d   : > { %3550 = vmatprep.mubr.msk.f32.mxu0 %vm494_vm2, %v4685_v42 }
 0x1a0   : > { %3551 = vmatmul.mubr.msk.f32.gmra.mrb[6].mxu0 %vm494_vm2, %v4701_v48 }
 0x1a1   : > { %3555 = vmatprep.mubr.msk.f32.mxu0 %vm494_vm2, %v4697_v46 }
 0x1a4   : > { %3556 = vmatmul.mubr.msk.f32.vlgmr.msra.gmra.mrb[0].mxu0 %vm494_vm2, %v483_v53 }
 0x1a5   : > { %3568 = vmatpush3.msk.msra.mxu0 %vm511_vm0, %v2964_v24  ;;  %3558 = vmatprep.mubr.msk.f32.mxu0 %vm494_vm2, %v4721_v56  ;;  %v3013_v24 = vld [vmem:[%s5556_s1 + $0x20] sm:$0xf] }
 0x1a6   : > { %3581 = vmatprep.subr.msk.mxu0 %vm511_vm0, %v2974_v55 }
 0x1a8   : > { %3559 = vmatmul.mubr.msk.f32.gmra.mrb[2].mxu0 %vm494_vm2, %v4735_v62 }
 0x1a9   : > { %3561 = vmatprep.mubr.msk.f32.mxu0 %vm494_vm2, %v4741_v1 }
 0x1ac   : > { %3562 = vmatmul.mubr.msk.f32.gmra.mrb[4].mxu0 %vm494_vm2, %v4747_v6 }
 0x1ad   : > { %3564 = vmatprep.mubr.msk.f32.mxu0 %vm494_vm2, %v4753_v10 }
 0x1b0   : > { %3565 = vmatmul.mubr.msk.f32.gmra.mrb[6].mxu0 %vm494_vm2, %v4758_v14 }
 0x1b1   : > { %3569 = vmatprep.mubr.msk.f32.mxu0 %vm494_vm2, %v4635_v22  ;;  %v471_v22 = vrot.slane %v425_v19, 1 }
 0x1b3   : > { %v490_v23 = vsel %vm481_vm1, %v471_v22, 0.0 }
 0x1b4   : > { %3570 = vmatmul.mubr.msk.f32.vlgmr.msra.gmra.mrb[0].mxu0 %vm494_vm2, %v4647_v27 }
 0x1b5   : > { %3582 = vmatpush3.msk.msra.mxu0 %vm511_vm0, %v2974_v55  ;;  %3572 = vmatprep.mubr.msk.f32.mxu0 %vm494_vm2, %v4661_v33 }
 0x1b6   : > { %3595 = vmatprep.subr.msk.mxu0 %vm511_vm0, %v2984_v17 }
 0x1b8   : > { %3573 = vmatmul.mubr.msk.f32.gmra.mrb[2].mxu0 %vm494_vm2, %v4667_v35 }
 0x1b9   : > { %3575 = vmatprep.mubr.msk.f32.mxu0 %vm494_vm2, %v4679_v40 }
 0x1bc   : > { %3576 = vmatmul.mubr.msk.f32.gmra.mrb[4].mxu0 %vm494_vm2, %v4685_v42 }
 0x1bd   : > { %3578 = vmatprep.mubr.msk.f32.mxu0 %vm494_vm2, %v4701_v48 }
 0x1c0   : > { %3579 = vmatmul.mubr.msk.f32.gmra.mrb[6].mxu0 %vm494_vm2, %v462_v21 }
 0x1c1   : > { %3583 = vmatprep.mubr.msk.f32.mxu0 %vm494_vm2, %v4583_v3  ;;  %v3004_v3 = vld [vmem:[%s5556_s1 + $0x1c] sm:$0xf] }
 0x1c4   : > { %3584 = vmatmul.mubr.msk.f32.vlgmr.msra.gmra.mrb[0].mxu0 %vm494_vm2, %v4581_v2 }
 0x1c5   : > { %3596 = vmatpush3.msk.msra.mxu0 %vm511_vm0, %v2984_v17  ;;  %3586 = vmatprep.mubr.msk.f32.mxu0 %vm494_vm2, %v4595_v8 }
 0x1c6   : > { %3609 = vmatprep.subr.msk.mxu0 %vm511_vm0, %v2994_v61 }
 0x1c8   : > { %3587 = vmatmul.mubr.msk.f32.gmra.mrb[2].mxu0 %vm494_vm2, %v4593_v7 }
 0x1c9   : > { %3589 = vmatprep.mubr.msk.f32.mxu0 %vm494_vm2, %v4604_v12 }
 0x1cc   : > { %3590 = vmatmul.mubr.msk.f32.gmra.mrb[4].mxu0 %vm494_vm2, %v4602_v11 }
 0x1cd   : > { %3592 = vmatprep.mubr.msk.f32.mxu0 %vm494_vm2, %v4613_v15 }
 0x1d0   : > { %3593 = vmatmul.mubr.msk.f32.gmra.mrb[6].mxu0 %vm494_vm2, %v425_v19 }
 0x1d1   : > { %3597 = vmatprep.mubr.msk.f32.mxu0 %vm494_vm2, %v483_v53 }
 0x1d4   : > { %3598 = vmatmul.mubr.msk.f32.vlgmr.msra.gmra.mrb[0].mxu0 %vm494_vm2, %v4721_v56 }
 0x1d5   : > { %3610 = vmatpush3.msk.msra.mxu0 %vm511_vm0, %v2994_v61  ;;  %3600 = vmatprep.mubr.msk.f32.mxu0 %vm494_vm2, %v4735_v62  ;;  %v3085_v61 = vld [vmem:[%s5558_s3 + $0x1a8] sm:$0xff] }
 0x1d6   : > { %3623 = vmatprep.subr.msk.mxu0 %vm511_vm0, %v3004_v3 }
 0x1d8   : > { %3601 = vmatmul.mubr.msk.f32.gmra.mrb[2].mxu0 %vm494_vm2, %v4741_v1 }
 0x1d9   : > { %3603 = vmatprep.mubr.msk.f32.mxu0 %vm494_vm2, %v4747_v6 }
 0x1dc   : > { %3604 = vmatmul.mubr.msk.f32.gmra.mrb[4].mxu0 %vm494_vm2, %v4753_v10 }
 0x1dd   : > { %3606 = vmatprep.mubr.msk.f32.mxu0 %vm494_vm2, %v4758_v14 }
 0x1e0   : > { %3607 = vmatmul.mubr.msk.f32.gmra.mrb[6].mxu0 %vm494_vm2, %v490_v23 }
 0x1e1   : > { %3611 = vmatprep.mubr.msk.f32.mxu0 %vm494_vm2, %v4647_v27  ;;  %v4047_v27 = vpack.c.bf16 %v3025_v26, %v3024_v25  ;;  %v1695_v26 = vld [vmem:[%s5558_s3 + $0x30] sm:$0xff] }
 0x1e4   : > { %3612 = vmatmul.mubr.msk.f32.vlgmr.msra.gmra.mrb[0].mxu0 %vm494_vm2, %v4661_v33  ;;  %v4063_v33 = vpack.c.bf16 %v3033_v32, %v3032_v31 }
 0x1e5   : > { %3624 = vmatpush3.msk.msra.mxu0 %vm511_vm0, %v3004_v3  ;;  %3614 = vmatprep.mubr.msk.f32.mxu0 %vm494_vm2, %v4667_v35  ;;  %v3035_v35 = vld [vmem:[%s5558_s3 + $0xd8] sm:$0xff] }
 0x1e6   : > { %3637 = vmatprep.subr.msk.mxu0 %vm511_vm0, %v3013_v24  ;;  %v4067_v36 = vpack.c.bf16 %v3035_v35, %v3034_v34  ;;  %v1698_v34 = vld [vmem:[%s5558_s3 + $0x48] sm:$0xff] }
 0x1e8   : > { %3615 = vmatmul.mubr.msk.f32.gmra.mrb[2].mxu0 %vm494_vm2, %v4679_v40  ;;  %v3038_v40 = vld [vmem:[%s5558_s3 + $0xf0] sm:$0xff] }
 0x1e9   : > { %3617 = vmatprep.mubr.msk.f32.mxu0 %vm494_vm2, %v4685_v42  ;;  %v4075_v42 = vpack.c.bf16 %v3039_v41, %v3038_v40  ;;  %v3089_v40 = vld [vmem:[%s5558_s3 + $0x1c8] sm:$0xff] }
 0x1ec   : > { %3618 = vmatmul.mubr.msk.f32.gmra.mrb[4].mxu0 %vm494_vm2, %v4701_v48 }
 0x1ed   : > { %3620 = vmatprep.mubr.msk.f32.mxu0 %vm494_vm2, %v462_v21  ;;  %v3084_v21 = vld [vmem:[%s5558_s3 + $0x1a0] sm:$0xff] }
 0x1f0   : > { %3621 = vmatmul.mubr.msk.f32.gmra.mrb[6].mxu0 %vm494_vm2, %v4617_v16  ;;  %v3030_v16 = vld [vmem:[%s5558_s3 + $0xb0] sm:$0xff] }
 0x1f1   : > { %3625 = vmatprep.mubr.msk.f32.mxu0 %vm494_vm2, %v4581_v2  ;;  %v3026_v2 = vld [vmem:[%s5558_s3 + $0x90] sm:$0xff]  ;;  %v4059_v30 = vpack.c.bf16 %v3031_v29, %v3030_v16  ;;  %v3087_v16 = vld [vmem:[%s5558_s3 + $0x1b8] sm:$0xff] }
 0x1f4   : > { %3626 = vmatmul.mubr.msk.f32.vlgmr.msra.gmra.mrb[0].mxu0 %vm494_vm2, %v4595_v8 }
 0x1f5   : > { %3638 = vmatpush3.msk.msra.mxu0 %vm511_vm0, %v3013_v24  ;;  %3628 = vmatprep.mubr.msk.f32.mxu0 %vm494_vm2, %v4593_v7  ;;  %v3027_v7 = vld [vmem:[%s5558_s3 + $0x98] sm:$0xff] }
 0x1f6   : > { %4048 = vmatprep.subr.bf16.mxu0 %v4047_v27  ;;  %v4051_v8 = vpack.c.bf16 %v3027_v7, %v3026_v2 }
 0x1f8   : > { %3629 = vmatmul.mubr.msk.f32.gmra.mrb[2].mxu0 %vm494_vm2, %v4604_v12  ;;  %v3029_v12 = vld [vmem:[%s5558_s3 + $0xa8] sm:$0xff] }
 0x1f9   : > { %3631 = vmatprep.mubr.msk.f32.mxu0 %vm494_vm2, %v4602_v11  ;;  %v3028_v11 = vld [vmem:[%s5558_s3 + $0xa0] sm:$0xff] }
 0x1fc   : > { %3632 = vmatmul.mubr.msk.f32.gmra.mrb[4].mxu0 %vm494_vm2, %v4613_v15  ;;  %v4055_v15 = vpack.c.bf16 %v3029_v12, %v3028_v11 }
 0x1fd   : > { %3634 = vmatprep.mubr.msk.f32.mxu0 %vm494_vm2, %v425_v19 }
 0x200   : > { %3635 = vmatmul.mubr.f32.gmra.mrb[6].mxu0 %v4517_v28 }
 0x201   : > { %3639 = vmatprep.mubr.msk.f32.mxu0 %vm494_vm2, %v4721_v56  ;;  %v1691_v56 = vld [vmem:[%s5558_s3 + $0x10] sm:$0xff] }
 0x202   : > { %v4083_v4 = vpack.c.bf16 %v1692_v57, %v1691_v56  ;;  %v3092_v56 = vld [vmem:[%s5558_s3 + $0x1e0] sm:$0xff]  ;;  %v3093_v57 = vld [vmem:[%s5558_s3 + $0x1e8] sm:$0xff] }
 0x204   : > { %3640 = vmatmul.mubr.msk.f32.vlgmr.msra.gmra.mrb[0].mxu0 %vm494_vm2, %v4735_v62  ;;  %v3083_v62 = vld [vmem:[%s5558_s3 + $0x198] sm:$0xff] }
 0x205   : > { %3642 = vmatprep.mubr.msk.f32.mxu0 %vm494_vm2, %v4741_v1  ;;  %4050 = vmatpush3.bf16.msra.mxu0 %v4047_v27  ;;  %v4147_v18 = vpack.c.bf16 %v3083_v62, %v3082_v60  ;;  %v1696_v27 = vld [vmem:[%s5558_s3 + $0x38] sm:$0xff]  ;;  %v1703_v60 = vld [vmem:[%s5558_s3 + $0x70] sm:$0xff] }
 0x206   : > { %4052 = vmatprep.subr.bf16.mxu0 %v4051_v8  ;;  %v4091_v31 = vpack.c.bf16 %v1696_v27, %v1695_v26  ;;  %v1704_v62 = vld [vmem:[%s5558_s3 + $0x78] sm:$0xff] }
 0x207   : > { %v3115_v26 = vld [vmem:[%s5558_s3 + $0x218] sm:$0xff] }
 0x208   : > { %3643 = vmatmul.mubr.msk.f32.gmra.mrb[2].mxu0 %vm494_vm2, %v4747_v6 }
 0x209   : > { %3645 = vmatprep.mubr.msk.f32.mxu0 %vm494_vm2, %v4753_v10  ;;  %4054 = vmatpush3.bf16.msra.mxu0 %v4051_v8  ;;  %v1694_v10 = vld [vmem:[%s5558_s3 + $0x28] sm:$0xff]  ;;  %v4151_v8 = vpack.c.bf16 %v3085_v61, %v3084_v21 }
 0x20a   : > { %4056 = vmatprep.subr.bf16.mxu0 %v4055_v15  ;;  %v3113_v21 = vld [vmem:[%s5558_s3 + $0x208] sm:$0xff] }
 0x20c   : > { %3646 = vmatmul.mubr.msk.f32.gmra.mrb[4].mxu0 %vm494_vm2, %v4758_v14 }
 0x20d   : > { %3648 = vmatprep.mubr.msk.f32.mxu0 %vm494_vm2, %v490_v23  ;;  %4058 = vmatpush3.bf16.msra.mxu0 %v4055_v15  ;;  %v4087_v23 = vpack.c.bf16 %v1694_v10, %v1693_v9  ;;  %v3086_v15 = vld [vmem:[%s5558_s3 + $0x1b0] sm:$0xff]  ;;  %v3200_v9 = vld [vmem:[%s5558_s3 + $0x400] sm:$0xff]  ;;  %v3201_v10 = vld [vmem:[%s5558_s3 + $0x408] sm:$0xff] }
 0x20e   : > { %4060 = vmatprep.subr.bf16.mxu0 %v4059_v30  ;;  %v4155_v37 = vpack.c.bf16 %v3087_v16, %v3086_v15  ;;  %v5117_v61 = vpack.c.bf16 %v3201_v10, %v3200_v9  ;;  %v3205_v15 = vld [vmem:[%s5558_s3 + $0x428] sm:$0xff] }
 0x20f   : > { %v3213_v9 = vld [vmem:[%s5558_s3 + $0x468] sm:$0xff] }
 0x210   : > { %3649 = vmatmul.mubr.msk.f32.gmra.mrb[6].mxu0 %vm494_vm2, %v4697_v46  ;;  %v1689_v46 = vld [vmem:[%s5558_s3] sm:$0xff] }
 0x211   : > { %4062 = vmatpush3.bf16.msra.mxu0 %v4059_v30  ;;  %3683 = vmatprep.mubr.f32.mxu0 %v4517_v28  ;;  %v4079_v48 = vpack.c.bf16 %v1690_v47, %v1689_v46 }
 0x212   : > { %4064 = vmatprep.subr.bf16.mxu0 %v4063_v33 }
 0x215   : > { %4066 = vmatpush3.bf16.msra.mxu0 %v4063_v33  ;;  %v1697_v33 = vld [vmem:[%s5558_s3 + $0x40] sm:$0xff] }
 0x216   : > { %4068 = vmatprep.subr.bf16.mxu0 %v4067_v36 }
 0x219   : > { %4070 = vmatpush3.bf16.msra.mxu0 %v4067_v36 }
 0x21a   : > { %4072 = vmatprep.subr.bf16.mxu0 %v4071_v39 }
 0x21d   : > { %4074 = vmatpush3.bf16.msra.mxu0 %v4071_v39  ;;  %v3088_v39 = vld [vmem:[%s5558_s3 + $0x1c0] sm:$0xff] }
 0x21e   : > { %4076 = vmatprep.subr.bf16.mxu0 %v4075_v42  ;;  %v4159_v47 = vpack.c.bf16 %v3089_v40, %v3088_v39  ;;  %v3207_v39 = vld [vmem:[%s5558_s3 + $0x438] sm:$0xff] }
 0x221   : > { %4078 = vmatpush3.bf16.msra.mxu0 %v4075_v42  ;;  %v4095_v42 = vpack.c.bf16 %v1698_v34, %v1697_v33  ;;  %v3117_v33 = vld [vmem:[%s5558_s3 + $0x228] sm:$0xff] }
 0x222   : > { %4080 = vmatprep.subr.bf16.mxu0 %v4079_v48 }
 0x2d7   : > { %v3641_v53 = vpop.f32.mrb[0].mxu0 }
 0x2d8   : > { %v1618_v54 = vadd.f32 %v3641_v53, %v4944_v52  ;;  %v1563_v55 = vpop.f32.mrb[1].mxu0  ;;  %v1701_v53 = vld [vmem:[%s5558_s3 + $0x60] sm:$0xff] }
 0x2d9   : > { %v1617_v58 = vadd.f32 %v4944_v52, %v1563_v55  ;;  %v4163_v55 = vpack.c.bf16 %v3091_v50, %v3090_v49  ;;  %v3209_v49 = vld [vmem:[%s5558_s3 + $0x448] sm:$0xff] }
 0x2da   : > { %v4954_v59 = vmax.f32 %v1618_v54, 0.0  ;;  %v1702_v54 = vld [vmem:[%s5558_s3 + $0x68] sm:$0xff] }
 0x2db   : > { %v4962_v0 = vmax.f32 %v1617_v58, 0.0  ;;  %v3644_v1 = vpop.f32.mrb[2].mxu0  ;;  %v4103_v58 = vpack.c.bf16 %v1702_v54, %v1701_v53  ;;  %v3120_v54 = vld [vmem:[%s5558_s3 + $0x240] sm:$0xff] }
 0x2dc   : > { %v1620_v5 = vadd.f32 %v3644_v1, %v4944_v52  ;;  %v1573_v6 = vpop.f32.mrb[3].mxu0  ;;  %v4978_v20 = vrot.slane %v4954_v59, 1  ;;  %v4167_v1 = vpack.c.bf16 %v3093_v57, %v3092_v56  ;;  %v3210_v57 = vld [vmem:[%s5558_s3 + $0x450] sm:$0xff] }
 0x2dd   : > { %v1619_v14 = vadd.f32 %v4944_v52, %v1573_v6  ;;  %3684 = vmatmul.mubr.f32.vlgmr.msra.gmra.mrb[8].mxu0 %v4962_v0  ;;  %v1665_v17 = vrot.slane %v4962_v0, 1  ;;  %v4107_v6 = vpack.c.bf16 %v1704_v62, %v1703_v60 }
 0x2de   : > { %v4974_v19 = vmax.f32 %v1620_v5, 0.0  ;;  %4082 = vmatpush3.bf16.msra.mxu0 %v4079_v48  ;;  %3686 = vmatprep.mubr.f32.mxu0 %v4954_v59  ;;  %v1641_v48 = vrot.slane %v4962_v0, 7  ;;  %v3095_v5 = vld [vmem:[%s5558_s3 + $0x1f8] sm:$0xff] }
 0x2df   : > { %v4986_v3 = vmax.f32 %v1619_v14, 0.0  ;;  %v3647_v22 = vpop.f32.mrb[4].mxu0  ;;  %3772 = vmatmul.mubr.msk.f32.vlgmr.msra.gmra.mrb[0].mxu1 %vm481_vm1, %v1665_v17  ;;  %4084 = vmatprep.subr.bf16.mxu0 %v4083_v4 }
 0x2e0   : > { %v1622_v24 = vadd.f32 %v3647_v22, %v4944_v52  ;;  %4146 = vmatpush3.bf16.msra.mxu1 %v4143_v51  ;;  %v1583_v25 = vpop.f32.mrb[5].mxu0  ;;  %3774 = vmatprep.mubr.msk.f32.mxu1 %vm481_vm1, %v4978_v20  ;;  %v5009_v12 = vrot.slane %v4974_v19, 1  ;;  %v4099_v51 = vpack.c.bf16 %v1700_v44, %v1699_v43  ;;  %v3202_v22 = vld [vmem:[%s5558_s3 + $0x410] sm:$0xff] }
 0x2e1   : > { %v1621_v2 = vadd.f32 %v4944_v52, %v1583_v25  ;;  %3687 = vmatmul.mubr.f32.gmra.mrb[10].mxu0 %v4986_v3  ;;  %4148 = vmatprep.subr.bf16.mxu1 %v4147_v18  ;;  %v5003_v7 = vrot.slane %v4986_v3, 1  ;;  %v3114_v25 = vld [vmem:[%s5558_s3 + $0x210] sm:$0xff] }
 0x2e2   : > { %v5005_v11 = vmax.f32 %v1622_v24, 0.0  ;;  %4086 = vmatpush3.bf16.msra.mxu0 %v4083_v4  ;;  %3689 = vmatprep.mubr.f32.mxu0 %v4974_v19  ;;  %v3094_v4 = vld [vmem:[%s5558_s3 + $0x1f0] sm:$0xff]  ;;  %v4179_v16 = vpack.c.bf16 %v3115_v26, %v3114_v25  ;;  %v3127_v26 = vld [vmem:[%s5558_s3 + $0x278] sm:$0xff] }
 0x2e3   : > { %v5017_v29 = vmax.f32 %v1621_v2, 0.0  ;;  %v5019_v30 = vpop.f32.mrb[6].mxu0  ;;  %3775 = vmatmul.mubr.msk.f32.gmra.mrb[2].mxu1 %vm481_vm1, %v5003_v7  ;;  %4088 = vmatprep.subr.bf16.mxu0 %v4087_v23  ;;  %v4171_v14 = vpack.c.bf16 %v3095_v5, %v3094_v4  ;;  %v5135_v2 = vrot.slane %v4954_v59, 7  ;;  %v3118_v44 = vld [vmem:[%s5558_s3 + $0x230] sm:$0xff]  ;;  %v3123_v4 = vld [vmem:[%s5558_s3 + $0x258] sm:$0xff] }
 0x2e4   : > { %4150 = vmatpush3.bf16.msra.mxu1 %v4147_v18  ;;  %v1593_v32 = vpop.f32.mrb[7].mxu0  ;;  %3777 = vmatprep.mubr.msk.f32.mxu1 %vm481_vm1, %v5009_v12  ;;  %v5038_v38 = vrot.slane %v5005_v11, 1  ;;  %v3112_v18 = vld [vmem:[%s5558_s3 + $0x200] sm:$0xff]  ;;  %v1624_v40 = vadd.f32 %v5019_v30, %v4944_v52  ;;  %v3126_v25 = vld [vmem:[%s5558_s3 + $0x270] sm:$0xff] }
 0x2e5   : > { %v1623_v35 = vadd.f32 %v4944_v52, %v1593_v32  ;;  %3690 = vmatmul.mubr.f32.gmra.mrb[12].mxu0 %v5017_v29  ;;  %4152 = vmatprep.subr.bf16.mxu1 %v4151_v8  ;;  %v5034_v36 = vrot.slane %v5017_v29, 1  ;;  %v4175_v24 = vpack.c.bf16 %v3113_v21, %v3112_v18  ;;  %v3116_v32 = vld [vmem:[%s5558_s3 + $0x220] sm:$0xff]  ;;  %v5186_v43 = vrot.slane %v5017_v29, 7  ;;  %v3119_v52 = vld [vmem:[%s5558_s3 + $0x238] sm:$0xff]  ;;  %v3125_v18 = vld [vmem:[%s5558_s3 + $0x268] sm:$0xff] }
 0x2e6   : > { %4090 = vmatpush3.bf16.msra.mxu0 %v4087_v23  ;;  %3692 = vmatprep.mubr.f32.mxu0 %v5005_v11  ;;  %v3203_v23 = vld [vmem:[%s5558_s3 + $0x418] sm:$0xff]  ;;  %v5212_v50 = vmax.f32 %v1624_v40, 0.0 }
 0x2e7   : > { %v5046_v41 = vmax.f32 %v1623_v35, 0.0  ;;  %3778 = vmatmul.mubr.msk.f32.gmra.mrb[4].mxu1 %vm481_vm1, %v5034_v36  ;;  %4092 = vmatprep.subr.bf16.mxu0 %v4091_v31  ;;  %v5132_v27 = vpack.c.bf16 %v3203_v23, %v3202_v22  ;;  %v5168_v35 = vrot.slane %v4974_v19, 7  ;;  %v3214_v22 = vld [vmem:[%s5558_s3 + $0x470] sm:$0xff]  ;;  %v3215_v23 = vld [vmem:[%s5558_s3 + $0x478] sm:$0xff] }
 0x2e8   : > { %4154 = vmatpush3.bf16.msra.mxu1 %v4151_v8  ;;  %3780 = vmatprep.mubr.msk.f32.mxu1 %vm481_vm1, %v5038_v38  ;;  %v3204_v8 = vld [vmem:[%s5558_s3 + $0x420] sm:$0xff]  ;;  %v1648_v60 = vrot.slane %v5212_v50, 7 }
 0x2e9   : > { %3693 = vmatmul.mubr.f32.gmra.mrb[14].mxu0 %v5046_v41  ;;  %4156 = vmatprep.subr.bf16.mxu1 %v4155_v37  ;;  %v5065_v46 = vrot.slane %v5046_v41, 1  ;;  %v5162_v34 = vpack.c.bf16 %v3205_v15, %v3204_v8  ;;  %v5222_v53 = vrot.slane %v5046_v41, 7  ;;  %v5296_v8 = vpack.c.bf16 %v3215_v23, %v3214_v22  ;;  %v3154_v23 = vld [vmem:[%s5558_s3 + $0x310] sm:$0xff] }
 0x2ea   : > { %4094 = vmatpush3.bf16.msra.mxu0 %v4091_v31  ;;  %3727 = vmatprep.mubr.msk.f32.mxu0 %vm5059_vm4, %v4607_v13  ;;  %v5150_v31 = vrot.slane %v4986_v3, 7  ;;  %v4203_v15 = vpack.c.bf16 %v3127_v26, %v3126_v25  ;;  %v3156_v26 = vld [vmem:[%s5558_s3 + $0x320] sm:$0xff] }
 0x2eb   : > { %3781 = vmatmul.mubr.msk.f32.gmra.mrb[6].mxu1 %vm481_vm1, %v5065_v46  ;;  %4096 = vmatprep.subr.bf16.mxu0 %v4095_v42 }
 0x2ec   : > { %4158 = vmatpush3.bf16.msra.mxu1 %v4155_v37  ;;  %3815 = vmatprep.mubr.msk.f32.mxu1 %vm5059_vm4, %v1641_v48  ;;  %v3206_v37 = vld [vmem:[%s5558_s3 + $0x430] sm:$0xff] }
 0x2ed   : > { %4160 = vmatprep.subr.bf16.mxu1 %v4159_v47  ;;  %v5198_v30 = vpack.c.bf16 %v3207_v39, %v3206_v37  ;;  %v3130_v37 = vld [vmem:[%s5558_s3 + $0x290] sm:$0xff]  ;;  %v3131_v39 = vld [vmem:[%s5558_s3 + $0x298] sm:$0xff] }
 0x2ee   : > { %4098 = vmatpush3.bf16.msra.mxu0 %v4095_v42  ;;  %v4183_v42 = vpack.c.bf16 %v3117_v33, %v3116_v32  ;;  %v3129_v32 = vld [vmem:[%s5558_s3 + $0x288] sm:$0xff]  ;;  %v4211_v40 = vpack.c.bf16 %v3131_v39, %v3130_v37  ;;  %v1672_v39 = vrot.slane %v5212_v50, 1 }
 0x2ef   : > { %4100 = vmatprep.subr.bf16.mxu0 %v4099_v51  ;;  %v3161_v37 = vld [vmem:[%s5558_s3 + $0x348] sm:$0xff] }
 0x2f0   : > { %4162 = vmatpush3.bf16.msra.mxu1 %v4159_v47  ;;  %v5204_v47 = vrot.slane %v5005_v11, 7 }
 0x2f1   : > { %4164 = vmatprep.subr.bf16.mxu1 %v4163_v55 }
 0x2f2   : > { %4102 = vmatpush3.bf16.msra.mxu0 %v4099_v51  ;;  %v4187_v51 = vpack.c.bf16 %v3119_v52, %v3118_v44  ;;  %v3133_v44 = vld [vmem:[%s5558_s3 + $0x2a8] sm:$0xff] }
 0x2f3   : > { %4104 = vmatprep.subr.bf16.mxu0 %v4103_v58 }
 0x2f4   : > { %4166 = vmatpush3.bf16.msra.mxu1 %v4163_v55  ;;  %v3121_v55 = vld [vmem:[%s5558_s3 + $0x248] sm:$0xff] }
 0x2f5   : > { %4168 = vmatprep.subr.bf16.mxu1 %v4167_v1  ;;  %v4191_v62 = vpack.c.bf16 %v3121_v55, %v3120_v54  ;;  %v3136_v54 = vld [vmem:[%s5558_s3 + $0x2c0] sm:$0xff]  ;;  %v3137_v55 = vld [vmem:[%s5558_s3 + $0x2c8] sm:$0xff] }
 0x2f6   : > { %4106 = vmatpush3.bf16.msra.mxu0 %v4103_v58  ;;  %v3211_v58 = vld [vmem:[%s5558_s3 + $0x458] sm:$0xff] }
 0x2f7   : > { %4108 = vmatprep.subr.bf16.mxu0 %v4107_v6  ;;  %v5263_v5 = vpack.c.bf16 %v3211_v58, %v3210_v57  ;;  %v4223_v57 = vpack.c.bf16 %v3137_v55, %v3136_v54  ;;  %v3138_v58 = vld [vmem:[%s5558_s3 + $0x2d0] sm:$0xff] }
 0x2f8   : > { %4170 = vmatpush3.bf16.msra.mxu1 %v4167_v1  ;;  %v3122_v1 = vld [vmem:[%s5558_s3 + $0x250] sm:$0xff] }
 0x2f9   : > { %4172 = vmatprep.subr.bf16.mxu1 %v4171_v14  ;;  %v4195_v10 = vpack.c.bf16 %v3123_v4, %v3122_v1  ;;  %v3140_v4 = vld [vmem:[%s5558_s3 + $0x2e0] sm:$0xff]  ;;  %v3166_v54 = vld [vmem:[%s5558_s3 + $0x370] sm:$0xff] }
 0x2fa   : > { %4110 = vmatpush3.bf16.msra.mxu0 %v4107_v6  ;;  %v3212_v6 = vld [vmem:[%s5558_s3 + $0x460] sm:$0xff] }
 0x2fb   : > { %4304 = vmatprep.subr.bf16.mxu0 %v5117_v61  ;;  %v5280_v21 = vpack.c.bf16 %v3213_v9, %v3212_v6  ;;  %v3141_v6 = vld [vmem:[%s5558_s3 + $0x2e8] sm:$0xff] }
 0x2fc   : > { %4174 = vmatpush3.bf16.msra.mxu1 %v4171_v14  ;;  %v3124_v14 = vld [vmem:[%s5558_s3 + $0x260] sm:$0xff]  ;;  %v4231_v9 = vpack.c.bf16 %v3141_v6, %v3140_v4  ;;  %v3187_v4 = vld [vmem:[%s5558_s3 + $0x398] sm:$0xff] }
 0x2fd   : > { %3728 = vmatmul.mubr.msk.f32.vlgmr.msra.gmra.mrb[8].mxu0 %vm5059_vm4, %v1641_v48  ;;  %4176 = vmatprep.subr.bf16.mxu1 %v4175_v24  ;;  %v3208_v48 = vld [vmem:[%s5558_s3 + $0x440] sm:$0xff] }
 0x2fe   : > { %3730 = vmatprep.mubr.msk.f32.mxu0 %vm5059_vm4, %v5135_v2  ;;  %4306 = vmatpush3.bf16.msra.mxu0 %v5117_v61  ;;  %v5234_v56 = vpack.c.bf16 %v3209_v49, %v3208_v48  ;;  %v3134_v48 = vld [vmem:[%s5558_s3 + $0x2b0] sm:$0xff]  ;;  %v3135_v49 = vld [vmem:[%s5558_s3 + $0x2b8] sm:$0xff] }
 0x2ff   : > { %3816 = vmatmul.mubr.msk.f32.vlgmr.msra.gmra.mrb[0].mxu1 %vm5059_vm4, %v5135_v2  ;;  %4308 = vmatprep.subr.bf16.mxu0 %v5132_v27 }
 0x300   : > { %3818 = vmatprep.mubr.msk.f32.mxu1 %vm5059_vm4, %v5150_v31  ;;  %4178 = vmatpush3.bf16.msra.mxu1 %v4175_v24  ;;  %v4199_v24 = vpack.c.bf16 %v3125_v18, %v3124_v14  ;;  %v3152_v14 = vld [vmem:[%s5558_s3 + $0x300] sm:$0xff]  ;;  %v3153_v18 = vld [vmem:[%s5558_s3 + $0x308] sm:$0xff] }
 0x301   : > { %3731 = vmatmul.mubr.msk.f32.gmra.mrb[10].mxu0 %vm5059_vm4, %v5150_v31  ;;  %4180 = vmatprep.subr.bf16.mxu1 %v4179_v16  ;;  %v4239_v22 = vpack.c.bf16 %v3153_v18, %v3152_v14  ;;  %v3191_v14 = vld [vmem:[%s5558_s3 + $0x3b8] sm:$0xff]  ;;  %v3193_v18 = vld [vmem:[%s5558_s3 + $0x3c8] sm:$0xff] }
 0x302   : > { %3733 = vmatprep.mubr.msk.f32.mxu0 %vm5059_vm4, %v5168_v35  ;;  %4310 = vmatpush3.bf16.msra.mxu0 %v5132_v27 }
 0x303   : > { %3819 = vmatmul.mubr.msk.f32.gmra.mrb[2].mxu1 %vm5059_vm4, %v5168_v35  ;;  %4312 = vmatprep.subr.bf16.mxu0 %v5162_v34 }
 0x304   : > { %3821 = vmatprep.mubr.msk.f32.mxu1 %vm5059_vm4, %v5186_v43  ;;  %4182 = vmatpush3.bf16.msra.mxu1 %v4179_v16  ;;  %v3128_v16 = vld [vmem:[%s5558_s3 + $0x280] sm:$0xff] }
 0x305   : > { %3734 = vmatmul.mubr.msk.f32.gmra.mrb[12].mxu0 %vm5059_vm4, %v5186_v43  ;;  %4184 = vmatprep.subr.bf16.mxu1 %v4183_v42  ;;  %v4207_v33 = vpack.c.bf16 %v3129_v32, %v3128_v16  ;;  %v3158_v32 = vld [vmem:[%s5558_s3 + $0x330] sm:$0xff] }
 0x306   : > { %3736 = vmatprep.mubr.msk.f32.mxu0 %vm5059_vm4, %v5204_v47  ;;  %4314 = vmatpush3.bf16.msra.mxu0 %v5162_v34 }
 0x307   : > { %3822 = vmatmul.mubr.msk.f32.gmra.mrb[4].mxu1 %vm5059_vm4, %v5204_v47  ;;  %4316 = vmatprep.subr.bf16.mxu0 %v5198_v30 }
 0x308   : > { %3824 = vmatprep.mubr.msk.f32.mxu1 %vm5059_vm4, %v5222_v53  ;;  %4186 = vmatpush3.bf16.msra.mxu1 %v4183_v42  ;;  %v3132_v42 = vld [vmem:[%s5558_s3 + $0x2a0] sm:$0xff] }
 0x309   : > { %3737 = vmatmul.mubr.msk.f32.gmra.mrb[14].mxu0 %vm5059_vm4, %v5222_v53  ;;  %4188 = vmatprep.subr.bf16.mxu1 %v4187_v51  ;;  %v4215_v52 = vpack.c.bf16 %v3133_v44, %v3132_v42  ;;  %v3162_v42 = vld [vmem:[%s5558_s3 + $0x350] sm:$0xff]  ;;  %v3163_v44 = vld [vmem:[%s5558_s3 + $0x358] sm:$0xff] }
 0x30a   : > { %4318 = vmatpush3.bf16.msra.mxu0 %v5198_v30  ;;  %4035 = vmatprep.mubr.msk.f32.mxu0 %vm481_vm1, %v4978_v20 }
 0x30b   : > { %3825 = vmatmul.mubr.msk.f32.gmra.mrb[6].mxu1 %vm5059_vm4, %v1648_v60  ;;  %4320 = vmatprep.subr.bf16.mxu0 %v5234_v56 }
 0x30c   : > { %4190 = vmatpush3.bf16.msra.mxu1 %v4187_v51  ;;  %3859 = vmatprep.mubr.f32.mxu1 %v4962_v0  ;;  %v4219_v51 = vpack.c.bf16 %v3135_v49, %v3134_v48  ;;  %v3143_v0 = vld [vmem:[%s5558_s3 + $0x2f8] sm:$0xff]  ;;  %v3164_v48 = vld [vmem:[%s5558_s3 + $0x360] sm:$0xff]  ;;  %v3165_v49 = vld [vmem:[%s5558_s3 + $0x368] sm:$0xff] }
 0x30d   : > { %4192 = vmatprep.subr.bf16.mxu1 %v4191_v62 }
 0x30e   : > { %4322 = vmatpush3.bf16.msra.mxu0 %v5234_v56 }
 0x30f   : > { %4324 = vmatprep.subr.bf16.mxu0 %v5263_v5 }
 0x310   : > { %4194 = vmatpush3.bf16.msra.mxu1 %v4191_v62  ;;  %v3139_v62 = vld [vmem:[%s5558_s3 + $0x2d8] sm:$0xff] }
 0x311   : > { %4196 = vmatprep.subr.bf16.mxu1 %v4195_v10  ;;  %v4227_v1 = vpack.c.bf16 %v3139_v62, %v3138_v58  ;;  %v3185_v58 = vld [vmem:[%s5558_s3 + $0x388] sm:$0xff] }
 0x312   : > { %4326 = vmatpush3.bf16.msra.mxu0 %v5263_v5 }
 0x313   : > { %4328 = vmatprep.subr.bf16.mxu0 %v5280_v21 }
 0x314   : > { %4198 = vmatpush3.bf16.msra.mxu1 %v4195_v10  ;;  %v3142_v10 = vld [vmem:[%s5558_s3 + $0x2f0] sm:$0xff] }
 0x315   : > { %4200 = vmatprep.subr.bf16.mxu1 %v4199_v24 }
 0x316   : > { %4330 = vmatpush3.bf16.msra.mxu0 %v5280_v21 }
 0x317   : > { %4332 = vmatprep.subr.bf16.mxu0 %v5296_v8 }
 0x318   : > { %4202 = vmatpush3.bf16.msra.mxu1 %v4199_v24  ;;  %v3155_v24 = vld [vmem:[%s5558_s3 + $0x318] sm:$0xff] }
 0x319   : > { %4204 = vmatprep.subr.bf16.mxu1 %v4203_v15  ;;  %v4243_v25 = vpack.c.bf16 %v3155_v24, %v3154_v23  ;;  %v3197_v23 = vld [vmem:[%s5558_s3 + $0x3e8] sm:$0xff] }
 0x31a   : > { %4334 = vmatpush3.bf16.msra.mxu0 %v5296_v8 }
 0x31c   : > { %4206 = vmatpush3.bf16.msra.mxu1 %v4203_v15  ;;  %v3157_v15 = vld [vmem:[%s5558_s3 + $0x328] sm:$0xff] }
 0x31d   : > { %4036 = vmatmul.mubr.msk.f32.vlgmr.msra.gmra.mrb[16].mxu0 %vm481_vm1, %v5003_v7  ;;  %4208 = vmatprep.subr.bf16.mxu1 %v4207_v33  ;;  %v4247_v16 = vpack.c.bf16 %v3157_v15, %v3156_v26 }
 0x31f   : > { %3860 = vmatmul.mubr.f32.vlgmr.msra.gmra.mrb[0].mxu1 %v4954_v59 }
 0x320   : > { %3862 = vmatprep.mubr.f32.mxu1 %v4986_v3  ;;  %4210 = vmatpush3.bf16.msra.mxu1 %v4207_v33  ;;  %v3159_v33 = vld [vmem:[%s5558_s3 + $0x338] sm:$0xff] }
 0x321   : > { %4212 = vmatprep.subr.bf16.mxu1 %v4211_v40 }
 0x323   : > { %3863 = vmatmul.mubr.f32.gmra.mrb[2].mxu1 %v4974_v19 }
 0x324   : > { %3865 = vmatprep.mubr.f32.mxu1 %v5017_v29  ;;  %4214 = vmatpush3.bf16.msra.mxu1 %v4211_v40 }
 0x325   : > { %4216 = vmatprep.subr.bf16.mxu1 %v4215_v52 }
 0x327   : > { %3866 = vmatmul.mubr.f32.gmra.mrb[4].mxu1 %v5005_v11 }
 0x328   : > { %3868 = vmatprep.mubr.f32.mxu1 %v5046_v41  ;;  %4218 = vmatpush3.bf16.msra.mxu1 %v4215_v52  ;;  %v4259_v52 = vpack.c.bf16 %v3163_v44, %v3162_v42 }
 0x329   : > { %4220 = vmatprep.subr.bf16.mxu1 %v4219_v51 }
 0x32b   : > { %3869 = vmatmul.mubr.f32.gmra.mrb[6].mxu1 %v5212_v50 }
 0x32c   : > { %4222 = vmatpush3.bf16.msra.mxu1 %v4219_v51  ;;  %3903 = vmatprep.mubr.msk.f32.mxu1 %vm481_vm1, %v1665_v17  ;;  %v4235_v17 = vpack.c.bf16 %v3143_v0, %v3142_v10  ;;  %v4263_v51 = vpack.c.bf16 %v3165_v49, %v3164_v48  ;;  %v3189_v10 = vld [vmem:[%s5558_s3 + $0x3a8] sm:$0xff] }
 0x32d   : > { %4224 = vmatprep.subr.bf16.mxu1 %v4223_v57 }
 0x330   : > { %4226 = vmatpush3.bf16.msra.mxu1 %v4223_v57  ;;  %v3184_v57 = vld [vmem:[%s5558_s3 + $0x380] sm:$0xff] }
 0x331   : > { %4228 = vmatprep.subr.bf16.mxu1 %v4227_v1  ;;  %v4271_v62 = vpack.c.bf16 %v3185_v58, %v3184_v57 }
 0x334   : > { %4230 = vmatpush3.bf16.msra.mxu1 %v4227_v1  ;;  %v3186_v1 = vld [vmem:[%s5558_s3 + $0x390] sm:$0xff] }
 0x335   : > { %4232 = vmatprep.subr.bf16.mxu1 %v4231_v9  ;;  %v4275_v6 = vpack.c.bf16 %v3187_v4, %v3186_v1 }
 0x338   : > { %4234 = vmatpush3.bf16.msra.mxu1 %v4231_v9  ;;  %v3188_v9 = vld [vmem:[%s5558_s3 + $0x3a0] sm:$0xff] }
 0x339   : > { %4236 = vmatprep.subr.bf16.mxu1 %v4235_v17  ;;  %v4279_v0 = vpack.c.bf16 %v3189_v10, %v3188_v9 }
 0x33c   : > { %4238 = vmatpush3.bf16.msra.mxu1 %v4235_v17  ;;  %v3190_v17 = vld [vmem:[%s5558_s3 + $0x3b0] sm:$0xff] }
 0x33d   : > { %4240 = vmatprep.subr.bf16.mxu1 %v4239_v22 }
 0x33f   : > { %3904 = vmatmul.mubr.msk.f32.vlgmr.msra.gmra.mrb[0].mxu1 %vm481_vm1, %v4978_v20  ;;  %v4251_v20 = vpack.c.bf16 %v3159_v33, %v3158_v32 }
 0x340   : > { %3906 = vmatprep.mubr.msk.f32.mxu1 %vm481_vm1, %v5003_v7  ;;  %4242 = vmatpush3.bf16.msra.mxu1 %v4239_v22  ;;  %v3160_v7 = vld [vmem:[%s5558_s3 + $0x340] sm:$0xff]  ;;  %v3195_v22 = vld [vmem:[%s5558_s3 + $0x3d8] sm:$0xff] }
 0x341   : > { %4244 = vmatprep.subr.bf16.mxu1 %v4243_v25  ;;  %v4255_v40 = vpack.c.bf16 %v3161_v37, %v3160_v7 }
 0x343   : > { %3907 = vmatmul.mubr.msk.f32.gmra.mrb[2].mxu1 %vm481_vm1, %v5009_v12 }
 0x344   : > { %3909 = vmatprep.mubr.msk.f32.mxu1 %vm481_vm1, %v5034_v36  ;;  %4246 = vmatpush3.bf16.msra.mxu1 %v4243_v25 }
 0x345   : > { %4248 = vmatprep.subr.bf16.mxu1 %v4247_v16 }
 0x347   : > { %3910 = vmatmul.mubr.msk.f32.gmra.mrb[4].mxu1 %vm481_vm1, %v5038_v38 }
 0x348   : > { %3912 = vmatprep.mubr.msk.f32.mxu1 %vm481_vm1, %v5065_v46  ;;  %4250 = vmatpush3.bf16.msra.mxu1 %v4247_v16 }
 0x349   : > { %4252 = vmatprep.subr.bf16.mxu1 %v4251_v20 }
 0x34b   : > { %3913 = vmatmul.mubr.msk.f32.gmra.mrb[6].mxu1 %vm481_vm1, %v1672_v39 }
 0x34c   : > { %4254 = vmatpush3.bf16.msra.mxu1 %v4251_v20  ;;  %3947 = vmatprep.mubr.msk.f32.mxu1 %vm5059_vm4, %v5135_v2  ;;  %v3167_v2 = vld [vmem:[%s5558_s3 + $0x378] sm:$0xff] }
 0x34d   : > { %4256 = vmatprep.subr.bf16.mxu1 %v4255_v40  ;;  %v4267_v55 = vpack.c.bf16 %v3167_v2, %v3166_v54 }
 0x350   : > { %4258 = vmatpush3.bf16.msra.mxu1 %v4255_v40 }
 0x351   : > { %4260 = vmatprep.subr.bf16.mxu1 %v4259_v52 }
 0x354   : > { %4262 = vmatpush3.bf16.msra.mxu1 %v4259_v52 }
 0x355   : > { %4264 = vmatprep.subr.bf16.mxu1 %v4263_v51 }
 0x358   : > { %4266 = vmatpush3.bf16.msra.mxu1 %v4263_v51 }
 0x359   : > { %4268 = vmatprep.subr.bf16.mxu1 %v4267_v55 }
 0x35c   : > { %4270 = vmatpush3.bf16.msra.mxu1 %v4267_v55 }
 0x35d   : > { %4272 = vmatprep.subr.bf16.mxu1 %v4271_v62 }
 0x35f   : > { %3948 = vmatmul.mubr.msk.f32.vlgmr.msra.gmra.mrb[0].mxu1 %vm5059_vm4, %v5150_v31  ;;  %v4283_v31 = vpack.c.bf16 %v3191_v14, %v3190_v17 }
 0x360   : > { %3950 = vmatprep.mubr.msk.f32.mxu1 %vm5059_vm4, %v5168_v35  ;;  %4274 = vmatpush3.bf16.msra.mxu1 %v4271_v62  ;;  %v3192_v35 = vld [vmem:[%s5558_s3 + $0x3c0] sm:$0xff] }
 0x361   : > { %4276 = vmatprep.subr.bf16.mxu1 %v4275_v6 }
 0x363   : > { %3951 = vmatmul.mubr.msk.f32.gmra.mrb[2].mxu1 %vm5059_vm4, %v5186_v43  ;;  %v4287_v43 = vpack.c.bf16 %v3193_v18, %v3192_v35 }
 0x364   : > { %3953 = vmatprep.mubr.msk.f32.mxu1 %vm5059_vm4, %v5204_v47  ;;  %4278 = vmatpush3.bf16.msra.mxu1 %v4275_v6  ;;  %v3194_v47 = vld [vmem:[%s5558_s3 + $0x3d0] sm:$0xff] }
 0x365   : > { %4280 = vmatprep.subr.bf16.mxu1 %v4279_v0 }
 0x367   : > { %3954 = vmatmul.mubr.msk.f32.gmra.mrb[4].mxu1 %vm5059_vm4, %v5222_v53  ;;  %v4291_v53 = vpack.c.bf16 %v3195_v22, %v3194_v47 }
 0x368   : > { %3956 = vmatprep.mubr.msk.f32.mxu1 %vm5059_vm4, %v1648_v60  ;;  %4282 = vmatpush3.bf16.msra.mxu1 %v4279_v0  ;;  %v3196_v60 = vld [vmem:[%s5558_s3 + $0x3e0] sm:$0xff] }
 0x369   : > { %4284 = vmatprep.subr.bf16.mxu1 %v4283_v31  ;;  %v4295_v24 = vpack.c.bf16 %v3197_v23, %v3196_v60 }
 0x36b   : > { %3957 = vmatmul.mubr.msk.f32.gmra.mrb[6].mxu1 %vm5059_vm4, %v4607_v13  ;;  %v3198_v13 = vld [vmem:[%s5558_s3 + $0x3f0] sm:$0xff] }
 0x36c   : > { %4286 = vmatpush3.bf16.msra.mxu1 %v4283_v31  ;;  %3991 = vmatprep.mubr.f32.mxu1 %v4954_v59  ;;  %v3199_v59 = vld [vmem:[%s5558_s3 + $0x3f8] sm:$0xff] }
 0x36d   : > { %4288 = vmatprep.subr.bf16.mxu1 %v4287_v43  ;;  %v4299_v45 = vpack.c.bf16 %v3199_v59, %v3198_v13 }
 0x370   : > { %4290 = vmatpush3.bf16.msra.mxu1 %v4287_v43 }
 0x371   : > { %4292 = vmatprep.subr.bf16.mxu1 %v4291_v53 }
 0x374   : > { %4294 = vmatpush3.bf16.msra.mxu1 %v4291_v53 }
 0x375   : > { %4296 = vmatprep.subr.bf16.mxu1 %v4295_v24 }
 0x378   : > { %4298 = vmatpush3.bf16.msra.mxu1 %v4295_v24 }
 0x379   : > { %4300 = vmatprep.subr.bf16.mxu1 %v4299_v45 }
 0x37c   : > { %4302 = vmatpush3.bf16.msra.mxu1 %v4299_v45 }
 0x37d   : > { %4335 = vmatprep.subr.bf16.mxu1 %v5117_v61 }
 0x37f   : > { %3992 = vmatmul.mubr.f32.vlgmr.msra.gmra.mrb[0].mxu1 %v4986_v3 }
 0x380   : > { %3994 = vmatprep.mubr.f32.mxu1 %v4974_v19  ;;  %4343 = vmatpush3.bf16.msra.mxu1 %v5117_v61 }
 0x381   : > { %4336 = vmatprep.subr.bf16.mxu1 %v5132_v27 }
 0x383   : > { %3995 = vmatmul.mubr.f32.gmra.mrb[2].mxu1 %v5017_v29 }
 0x384   : > { %3997 = vmatprep.mubr.f32.mxu1 %v5005_v11  ;;  %4344 = vmatpush3.bf16.msra.mxu1 %v5132_v27 }
 0x385   : > { %4337 = vmatprep.subr.bf16.mxu1 %v5162_v34 }
 0x387   : > { %3998 = vmatmul.mubr.f32.gmra.mrb[4].mxu1 %v5046_v41 }
 0x388   : > { %4000 = vmatprep.mubr.f32.mxu1 %v5212_v50  ;;  %4345 = vmatpush3.bf16.msra.mxu1 %v5162_v34 }
 0x389   : > { %4338 = vmatprep.subr.bf16.mxu1 %v5198_v30 }
 0x38b   : > { %4001 = vmatmul.mubr.f32.gmra.mrb[6].mxu1 %v4517_v28 }
 0x38c   : > { %4346 = vmatpush3.bf16.msra.mxu1 %v5198_v30  ;;  %4038 = vmatprep.mubr.msk.f32.mxu1 %vm481_vm1, %v5009_v12  ;;  %v3224_v30 = vld [vmem:[%s5559_s4] ss:$0 sm:$0xff] }
 0x38d   : > { %4339 = vmatprep.subr.bf16.mxu1 %v5234_v56 }
 0x390   : > { %4347 = vmatpush3.bf16.msra.mxu1 %v5234_v56 }
 0x391   : > { %4340 = vmatprep.subr.bf16.mxu1 %v5263_v5 }
 0x394   : > { %4348 = vmatpush3.bf16.msra.mxu1 %v5263_v5 }
 0x395   : > { %4341 = vmatprep.subr.bf16.mxu1 %v5280_v21 }
 0x398   : > { %4349 = vmatpush3.bf16.msra.mxu1 %v5280_v21 }
 0x399   : > { %4342 = vmatprep.subr.bf16.mxu1 %v5296_v8 }
 0x39c   : > { %4350 = vmatpush3.bf16.msra.mxu1 %v5296_v8 }
 0x39f   : > { %4039 = vmatmul.mubr.msk.f32.vlgmr.msra.gmra.mrb[2].mxu1 %vm481_vm1, %v5034_v36 }
 0x3a0   : > { %4041 = vmatprep.mubr.msk.f32.mxu1 %vm481_vm1, %v5038_v38 }
 0x3a3   : > { %4042 = vmatmul.mubr.msk.f32.gmra.mrb[4].mxu1 %vm481_vm1, %v5065_v46 }
 0x3a4   : > { %4044 = vmatprep.mubr.msk.f32.mxu1 %vm481_vm1, %v1672_v39 }
 0x3a7   : > { %4045 = vmatmul.mubr.msk.f32.gmra.mrb[6].mxu1 %vm481_vm1, %v4577_v63 }
 0x3d0   : > { %v3729_v28 = vpop.f32.mrb[8].mxu0 }
 0x3d1   : > { %v1893_v19 = vpop.f32.mrb[9].mxu0 }
 0x3d4   : > { %v3732_v3 = vpop.f32.mrb[10].mxu0 }
 0x3d5   : > { %v1903_v11 = vpop.f32.mrb[11].mxu0 }
 0x3d8   : > { %v3735_v12 = vpop.f32.mrb[12].mxu0 }
 0x3d9   : > { %v1913_v29 = vpop.f32.mrb[13].mxu0 }
 0x3dc   : > { %v3738_v36 = vpop.f32.mrb[14].mxu0 }
 0x3dd   : > { %v1923_v41 = vpop.f32.mrb[15].mxu0 }
 0x3f0   : > { %v4037_v38 = vpop.f32.mrb[16].mxu0 }
 0x3f1   : > { %v2795_v61 = vpop.f32.mrb[17].mxu0 }
 0x452   : > { %v3993_v27 = vpop.f32.mrb[0].mxu1 }
 0x453   : > { %v4351_v46 = vadd.f32 %v3993_v27, %v3729_v28  ;;  %v2665_v34 = vpop.f32.mrb[1].mxu1 }
 0x454   : > { %v4353_v50 = vadd.f32 %v2665_v34, %v1893_v19 }
 0x455   : > { %v4352_v63 = vadd.f32 %v4351_v46, %v4037_v38 }
 0x456   : > { %v4354_v56 = vadd.f32 %v4353_v50, %v2795_v61 }
 0x457   : > { %v2850_v5 = vadd.f32 %v4352_v63, %v3224_v30 }
 0x458   : > { %v2849_v21 = vadd.f32 %v4354_v56, %v3224_v30 }
 0x459   : > { %v2858_v8 = vmax.f32 %v2850_v5, 0.0 }
 0x45a   : > { %v2857_v25 = vmax.f32 %v2849_v21, 0.0 }
 0x45b   : > { %2866 = vst [vmem:[%s5542_s24 + $0x8] sm:$0xff] %v2858_v8 }
 0x45c   : > { %2865 = vst [vmem:[%s5542_s24] sm:$0xff] %v2857_v25 }
 0x472   : > { %v4040_v26 = vpop.f32.mrb[2].mxu1 }
 0x473   : > { %v4355_v15 = vadd.f32 %v4040_v26, %v3732_v3  ;;  %v2805_v16 = vpop.f32.mrb[3].mxu1 }
 0x474   : > { %v4356_v32 = vadd.f32 %v2805_v16, %v1903_v11 }
 0x475   : > { %v2852_v33 = vadd.f32 %v4355_v15, %v3224_v30 }
 0x476   : > { %v2851_v20 = vadd.f32 %v4356_v32, %v3224_v30  ;;  %v4043_v7 = vpop.f32.mrb[4].mxu1 }
 0x477   : > { %v2860_v37 = vmax.f32 %v2852_v33, 0.0  ;;  %v4357_v39 = vadd.f32 %v4043_v7, %v3735_v12  ;;  %v2815_v40 = vpop.f32.mrb[5].mxu1 }
 0x478   : > { %v2859_v42 = vmax.f32 %v2851_v20, 0.0  ;;  %v4358_v44 = vadd.f32 %v2815_v40, %v1913_v29 }
 0x479   : > { %2868 = vst [vmem:[%s5542_s24 + $0x18] sm:$0xff] %v2860_v37  ;;  %v2854_v52 = vadd.f32 %v4357_v39, %v3224_v30 }
 0x47a   : > { %2867 = vst [vmem:[%s5542_s24 + $0x10] sm:$0xff] %v2859_v42  ;;  %v2853_v48 = vadd.f32 %v4358_v44, %v3224_v30  ;;  %v4046_v49 = vpop.f32.mrb[6].mxu1 }
 0x47b   : > { %v2862_v51 = vmax.f32 %v2854_v52, 0.0  ;;  %v4359_v54 = vadd.f32 %v4046_v49, %v3738_v36  ;;  %v2825_v2 = vpop.f32.mrb[7].mxu1 }
 0x47c   : > { %v2861_v55 = vmax.f32 %v2853_v48, 0.0  ;;  %v4360_v57 = vadd.f32 %v2825_v2, %v1923_v41 }
 0x47d   : > { %2870 = vst [vmem:[%s5542_s24 + $0x28] sm:$0xff] %v2862_v51  ;;  %v2856_v58 = vadd.f32 %v4359_v54, %v3224_v30 }
 0x47e   : > { %2869 = vst [vmem:[%s5542_s24 + $0x20] sm:$0xff] %v2861_v55  ;;  %v2855_v62 = vadd.f32 %v4360_v57, %v3224_v30 }
 0x47f   : > { %v2864_v1 = vmax.f32 %v2856_v58, 0.0 }
 0x480   : > { %v2863_v4 = vmax.f32 %v2855_v62, 0.0 }
 0x481   : > { %2872 = vst [vmem:[%s5542_s24 + $0x38] sm:$0xff] %v2864_v1 }
 0x482   : > { %2871 = vst [vmem:[%s5542_s24 + $0x30] sm:$0xff] %v2863_v4 }
 0x483 PF: > { %s15_s18 = sadd.s32 1, %s4505_s18  }
 0x484   : > { %p12_p4 = scmp.ge.s32.totalorder %s15_s18, 4  }
 0x486   :  { %14 = sbr.rel (!%p12_p4) target bundleno = 1 (0x1), region = 86 }

</bundles_post_ra>
